<compile_context>
chip_gen: v7x
topology: tpu7x:2x2x1
jax: 0.10.0
libtpu: 0.0.40
codegen_flags: <defaults>
</compile_context>

<pallas_src>
import functools
import math

import jax
import jax.numpy as jnp
from jax.experimental import pallas as pl
from jax.experimental.pallas import tpu as pltpu

_MIB = 1024 * 1024
_KV_UNROLL_MAX = 4   # fully unroll the kv online-softmax loop only when short
_Q_UNROLL_MAX = 2    # fully unroll the query-block loop only when short


def _cosmos_spatial_attn_kernel(x_ref, gnw_ref, gnb_ref, wq_ref, bq_ref,
                                wkv_ref, bv_ref, wo_ref, bo_ref, o_ref,
                                k_scr, v_scr, *,
                                num_heads, head_dim, eps, q_block, kv_block):
    f, s, c = x_ref.shape
    fh = f * num_heads
    num_q = s // q_block
    num_kv = s // kv_block

    # ---- GroupNorm(num_groups=1) per frame: two-pass f32 statistics ----
    x = x_ref[...].astype(jnp.float32)                          # (F, S, C)
    inv_n = 1.0 / (s * c)
    mean = jnp.sum(jnp.sum(x, axis=2, keepdims=True), axis=1,
                   keepdims=True) * inv_n                       # (F, 1, 1)
    xc = x - mean
    var = jnp.sum(jnp.sum(xc * xc, axis=2, keepdims=True), axis=1,
                  keepdims=True) * inv_n                        # (F, 1, 1)
    inv_std = jax.lax.rsqrt(var + eps)

    gamma = gnw_ref[0]                                          # (C,)
    beta = gnb_ref[0]                                           # (C,)
    scale_fc = inv_std * gamma                                  # (F, 1, C)
    shift_fc = beta - mean * scale_fc                           # (F, 1, C)

    # ---- fused K/V projection over the whole (F*S, C) slab; bias only on V
    #      (bk cancels in softmax).  Results go straight into bf16 VMEM scratch
    #      so the f32 x / xn / kv temporaries die before the attention loops. ----
    xn = (xc * scale_fc + beta).astype(jnp.bfloat16)            # (F, S, C) bf16
    kv = jnp.dot(xn.reshape(f * s, c), wkv_ref[...],
                 preferred_element_type=jnp.float32)            # (F*S, 2C) f32

    def to_heads(t2d):                                          # (F*S,C)->(F*H,S,hd)
        if num_heads == 1:
            return t2d.reshape(f, s, head_dim)
        t = t2d.reshape(f, s, num_heads, head_dim)
        return jnp.swapaxes(t, 1, 2).reshape(fh, s, head_dim)

    k_scr[...] = to_heads(kv[:, :c].astype(jnp.bfloat16))
    v_scr[...] = to_heads((kv[:, c:] + bv_ref[0]).astype(jnp.bfloat16))

    # ---- flash-style attention: query-block loop, kv-block online softmax ----
    def kv_step(j, carry, q_b):
        m, l, acc = carry
        if isinstance(j, int):
            klo = j * kv_block
        else:
            klo = pl.multiple_of(j * kv_block, kv_block)
        kb = k_scr[:, pl.ds(klo, kv_block), :]                  # (FH, kb, hd) bf16
        vb = v_scr[:, pl.ds(klo, kv_block), :]
        sc = jnp.einsum('bqd,bkd->bqk', q_b, kb,
                        preferred_element_type=jnp.float32)     # (FH, qb, kb) f32
        m_new = jnp.maximum(m, jnp.max(sc, axis=-1, keepdims=True))
        alpha = jnp.exp(m - m_new)
        p = jnp.exp(sc - m_new)
        l_new = alpha * l + jnp.sum(p, axis=-1, keepdims=True)
        acc_new = alpha * acc + jnp.einsum(
            'bqk,bkd->bqd', p.astype(jnp.bfloat16), vb,
            preferred_element_type=jnp.float32)
        return m_new, l_new, acc_new

    def q_step(qi):
        if isinstance(qi, int):
            qlo = qi * q_block
        else:
            qlo = pl.multiple_of(qi * q_block, q_block)
        # Reload the (un-normalized) rows for this q tile from the VMEM input
        # block: used for the Q projection (cheap re-normalization) and for the
        # residual add -- no full-block f32 copy kept live across the loops.
        x_blk = x_ref[:, pl.ds(qlo, q_block), :].astype(jnp.float32)  # (F,qb,C)
        xn_blk = (x_blk * scale_fc + shift_fc).astype(jnp.bfloat16)
        qp = jnp.dot(xn_blk.reshape(f * q_block, c), wq_ref[...],
                     preferred_element_type=jnp.float32) + bq_ref[0]  # scaled Q
        if num_heads == 1:
            q_b = qp.reshape(f, q_block, head_dim).astype(jnp.bfloat16)
        else:
            q_b = jnp.swapaxes(qp.reshape(f, q_block, num_heads, head_dim), 1, 2)
            q_b = q_b.reshape(fh, q_block, head_dim).astype(jnp.bfloat16)

        m0 = jnp.full((fh, q_block, 1), -jnp.inf, jnp.float32)
        l0 = jnp.zeros((fh, q_block, 1), jnp.float32)
        acc0 = jnp.zeros((fh, q_block, head_dim), jnp.float32)
        if num_kv <= _KV_UNROLL_MAX:
            carry = (m0, l0, acc0)
            for j in range(num_kv):                              # static unroll
                carry = kv_step(j, carry, q_b)
            m, l, acc = carry
        else:
            m, l, acc = jax.lax.fori_loop(
                0, num_kv, lambda j, cr: kv_step(j, cr, q_b), (m0, l0, acc0))

        out = acc * pl.reciprocal(l, approx=True)                # (FH, qb, hd) f32
        if num_heads == 1:
            out2d = out.reshape(f * q_block, c)
        else:
            out2d = jnp.swapaxes(
                out.reshape(f, num_heads, q_block, head_dim), 1, 2)
            out2d = out2d.reshape(f * q_block, c)

        # output projection (to_out[0]); Dropout(0.0) identity; residual in f32.
        o = jnp.dot(out2d.astype(jnp.bfloat16), wo_ref[...],
                    preferred_element_type=jnp.float32) + bo_ref[0]
        o = o.reshape(f, q_block, c) + x_blk
        o_ref[:, pl.ds(qlo, q_block), :] = o.astype(o_ref.dtype)

    if num_q <= _Q_UNROLL_MAX:
        for qi in range(num_q):                                  # static unroll
            q_step(qi)
    else:
        @pl.loop(0, num_q)
        def _(qi):
            q_step(qi)


# --------------------------- wrapper / heuristics ---------------------------

def _tpu_vmem_capacity_bytes():
    try:
        cap = int(pltpu.get_tpu_info().vmem_capacity_bytes)
        if cap > 0:
            return cap
    except Exception:
        pass
    return 64 * _MIB   # conservative (v7x per-TC)


def _pick_kv_block(s, vmem_cap):
    """kv-block size: full S when small; otherwise the largest divisor of S that
    is a multiple of 256 (then 128) below a generation-aware cap."""
    max_kv = 512 if vmem_cap <= 64 * _MIB else 1024
    if s <= max_kv:
        return s
    for mult in (256, 128):                      # MXU/lane-friendly widths first
        best = 0
        for d in range(mult, max_kv + 1, mult):
            if s % d == 0:
                best = d
        if best:
            return best
    best = 1
    for d in range(1, max_kv + 1):
        if s % d == 0:
            best = d
    return best if best >= 8 else s              # guard pathological tiny blocks


def _pick_q_block(s, vmem_cap):
    max_q = 256 if vmem_cap <= 64 * _MIB else 512
    if s <= max_q:
        return s
    for mult in (256, 128):
        best = 0
        for d in range(mult, max_q + 1, mult):
            if s % d == 0:
                best = d
        if best:
            return best
    best = 1
    for d in range(1, max_q + 1):
        if s % d == 0:
            best = d
    return best if best >= 8 else s


def _estimate_step_vmem_bytes(f, s, c, q_block, kv_block, num_heads, in_itemsize):
    """Rough per-grid-step VMEM footprint (double-buffered I/O blocks, bf16 K/V
    scratch, projection transients, per-q-tile working set, weights)."""
    fh = f * num_heads
    hd = c // num_heads
    blk = f * s * c
    io = 2 * 2 * blk * in_itemsize                       # in + out, double-buffered
    kv_scratch = 2 * fh * s * hd * 2                     # K, V bf16 scratch
    proj = blk * (4 + 2 + 8 + 4)                         # x f32, xn bf16, KV f32+bf16
    qset = (f * q_block * c * (4 + 2 + 4 + 2 + 4 + 4)    # x/xn/q/out tiles
            + fh * q_block * kv_block * (4 + 4 + 2)      # scores, p f32 + p bf16
            + fh * q_block * (hd + 2) * 4)               # acc, m, l
    weights = 2 * (c * c * 2 + c * 2 * c * 2 + c * c * 2 + 6 * c * 4)
    return io + kv_scratch + proj + qset + weights


def _pick_frames_per_block(bt, s, c, q_block, kv_block, num_heads,
                           in_itemsize, budget_bytes, min_steps=4):
    """Largest divisor F of bt fitting the VMEM budget while leaving at least
    min_steps grid steps (>=2 steps per v7x TensorCore for DMA/compute overlap)."""
    need_steps = min(min_steps, bt)
    best = 1
    for f_cand in range(1, bt + 1):
        if bt % f_cand:
            continue
        if bt // f_cand < need_steps:
            continue
        if _estimate_step_vmem_bytes(f_cand, s, c, q_block, kv_block,
                                     num_heads, in_itemsize) <= budget_bytes:
            best = f_cand
    return best


def cosmos_spatial_attention_tokens(x_tok, params, num_attention_heads,
                                    frames_per_block=None, kv_block=None,
                                    q_block=None):
    """Channels-last token API: x_tok is [B*T, H*W, C] (preferred entry point)."""
    # TODO(synk): attention_mask is not supported (the spatial processor always
    #             passes None in the Cosmos VAE).
    bt, s, c = x_tok.shape
    assert c % num_attention_heads == 0
    head_dim = c // num_attention_heads
    scale = 1.0 / math.sqrt(head_dim)

    vmem_cap = _tpu_vmem_capacity_bytes()
    # Headroom for Mosaic internal scratch: ~48 MiB on a 64 MiB (v7x) TC,
    # ~100 MiB on 128 MiB (v5e/v6e) chips.
    vmem_limit = int(max(min(vmem_cap - 16 * _MIB, 100 * _MIB), 32 * _MIB))

    if kv_block is None:
        kv_block = _pick_kv_block(s, vmem_cap)
    assert s % kv_block == 0
    if q_block is None:
        q_block = _pick_q_block(s, vmem_cap)
    assert s % q_block == 0
    if frames_per_block is None:
        frames_per_block = _pick_frames_per_block(
            bt, s, c, q_block, kv_block, num_attention_heads,
            x_tok.dtype.itemsize, budget_bytes=int(0.85 * vmem_limit))
    assert bt % frames_per_block == 0

    # Fold the softmax scale into Wq / bq; fuse K and V into one (C, 2C) matmul;
    # pre-cast matmul weights to bf16 (f32 accumulation in-kernel).  bk dropped.
    wq = (params["wq"].T * scale).astype(jnp.bfloat16)                 # (C, C)
    bq = (params["bq"] * scale).reshape(1, c).astype(jnp.float32)
    wkv = jnp.concatenate([params["wk"].T, params["wv"].T],
                          axis=1).astype(jnp.bfloat16)                 # (C, 2C)
    bv = params["bv"].reshape(1, c).astype(jnp.float32)
    wo = params["wo"].T.astype(jnp.bfloat16)                           # (C, C)
    bo = params["bo"].reshape(1, c).astype(jnp.float32)
    gn_w = params["gn_w"].reshape(1, c).astype(jnp.float32)
    gn_b = params["gn_b"].reshape(1, c).astype(jnp.float32)

    kernel = functools.partial(
        _cosmos_spatial_attn_kernel, num_heads=num_attention_heads,
        head_dim=head_dim, eps=1e-6, q_block=q_block, kv_block=kv_block)

    tok_spec = pl.BlockSpec((frames_per_block, s, c), lambda i: (i, 0, 0))
    vec_c = pl.BlockSpec((1, c), lambda i: (0, 0))
    mat_cc = pl.BlockSpec((c, c), lambda i: (0, 0))
    mat_c2c = pl.BlockSpec((c, 2 * c), lambda i: (0, 0))
    in_specs = [tok_spec, vec_c, vec_c, mat_cc, vec_c, mat_c2c, vec_c,
                mat_cc, vec_c]

    fh = frames_per_block * num_attention_heads
    scratch_shapes = [pltpu.VMEM((fh, s, head_dim), jnp.bfloat16),   # K
                      pltpu.VMEM((fh, s, head_dim), jnp.bfloat16)]   # V

    return pl.pallas_call(
        kernel,
        out_shape=jax.ShapeDtypeStruct((bt, s, c), x_tok.dtype),
        grid_spec=pltpu.PrefetchScalarGridSpec(
            num_scalar_prefetch=0,
            grid=(bt // frames_per_block,),
            in_specs=in_specs,
            out_specs=tok_spec,
            scratch_shapes=scratch_shapes),
        compiler_params=pltpu.CompilerParams(
            dimension_semantics=("parallel",),
            vmem_limit_bytes=vmem_limit),
    )(x_tok, gn_w, gn_b, wq, bq, wkv, bv, wo, bo)


def cosmos_causal_attention(x, params, num_attention_heads, **kwargs):
    """PyTorch-layout adapter: x is [B, C, T, H, W]."""
    b, c, t, h, w = x.shape
    x_tok = jnp.transpose(x, (0, 2, 3, 4, 1)).reshape(b * t, h * w, c)
    out_tok = cosmos_spatial_attention_tokens(
        x_tok, params, num_attention_heads, **kwargs)
    return jnp.transpose(out_tok.reshape(b, t, h, w, c), (0, 4, 1, 2, 3))


def init_params(key, channels):
    """Deterministic synthetic parameters (shapes match the PyTorch module)."""
    ks = jax.random.split(key, 8)
    scale = 0.05
    return {
        "gn_w": jnp.ones((channels,), jnp.float32),
        "gn_b": jnp.zeros((channels,), jnp.float32),
        "wq": scale * jax.random.normal(ks[0], (channels, channels), jnp.float32),
        "bq": scale * jax.random.normal(ks[1], (channels,), jnp.float32),
        "wk": scale * jax.random.normal(ks[2], (channels, channels), jnp.float32),
        "bk": scale * jax.random.normal(ks[3], (channels,), jnp.float32),
        "wv": scale * jax.random.normal(ks[4], (channels, channels), jnp.float32),
        "bv": scale * jax.random.normal(ks[5], (channels,), jnp.float32),
        "wo": scale * jax.random.normal(ks[6], (channels, channels), jnp.float32),
        "bo": scale * jax.random.normal(ks[7], (channels,), jnp.float32),
    }


def _reference(x, params, num_heads):
    """Pure-JAX f32 reference of the PyTorch spatial attention processor."""
    b, c, t, h, w = x.shape
    s = h * w
    hd = c // num_heads
    xt = jnp.transpose(x, (0, 2, 3, 4, 1)).reshape(b * t, s, c)
    mean = jnp.mean(xt, axis=(1, 2), keepdims=True)
    var = jnp.mean((xt - mean) ** 2, axis=(1, 2), keepdims=True)
    xn = (xt - mean) / jnp.sqrt(var + 1e-6) * params["gn_w"] + params["gn_b"]
    q = xn @ params["wq"].T + params["bq"]
    k = xn @ params["wk"].T + params["bk"]
    v = xn @ params["wv"].T + params["bv"]

    def split(a):
        return jnp.swapaxes(a.reshape(b * t, s, num_heads, hd), 1, 2)

    qh, kh, vh = split(q), split(k), split(v)
    scores = jnp.einsum('bhqd,bhkd->bhqk', qh, kh) / jnp.sqrt(hd)
    probs = jax.nn.softmax(scores, axis=-1)
    o = jnp.einsum('bhqk,bhkd->bhqd', probs, vh)
    o = jnp.swapaxes(o, 1, 2).reshape(b * t, s, c)
    o = o @ params["wo"].T + params["bo"] + xt
    return jnp.transpose(o.reshape(b, t, h, w, c), (0, 4, 1, 2, 3))


if __name__ == "__main__":
    key = jax.random.PRNGKey(0)
    k_x, k_p = jax.random.split(key)

    # CosmosMidBlock3d uses num_attention_heads=1, attention_head_dim=in_channels.
    # C=128 keeps the output lane-dense (no masked partial stores).
    B, C, T, H, W = 2, 128, 2, 8, 8
    NUM_HEADS = 1

    x = jax.random.normal(k_x, (B, C, T, H, W), jnp.float32)
    params = init_params(k_p, C)
    ref = jax.block_until_ready(_reference(x, params, NUM_HEADS))

    # 1) default blocking (single kv / q block at this small S -> unrolled path).
    out = jax.block_until_ready(cosmos_causal_attention(x, params, NUM_HEADS))
    assert out.shape == (B, C, T, H, W)
    assert bool(jnp.all(jnp.isfinite(out)))
    assert bool(jnp.allclose(out, ref, atol=3e-2, rtol=3e-2))

    # 2) force small q/kv blocks so the fori_loop online-softmax and the pl.loop
    #    query-block paths are exercised and validated on-device too.
    out2 = jax.block_until_ready(cosmos_causal_attention(
        x, params, NUM_HEADS, kv_block=8, q_block=16, frames_per_block=1))
    assert bool(jnp.allclose(out2, ref, atol=3e-2, rtol=3e-2))

    print("KERNEL_OK")
</pallas_src>

<mosaic_0001>
module attributes {stable_mosaic.version = 11 : i64} {
  func.func @_cosmos_spatial_attn_kernel(%arg0: i32, %arg1: memref<1x64x128xf32, #tpu.memory_space<vmem>>, %arg2: memref<1x128xf32, #tpu.memory_space<vmem>>, %arg3: memref<1x128xf32, #tpu.memory_space<vmem>>, %arg4: memref<128x128xbf16, #tpu.memory_space<vmem>>, %arg5: memref<1x128xf32, #tpu.memory_space<vmem>>, %arg6: memref<128x256xbf16, #tpu.memory_space<vmem>>, %arg7: memref<1x128xf32, #tpu.memory_space<vmem>>, %arg8: memref<128x128xbf16, #tpu.memory_space<vmem>>, %arg9: memref<1x128xf32, #tpu.memory_space<vmem>>, %arg10: memref<1x64x128xf32, #tpu.memory_space<vmem>>, %arg11: memref<1x64x128xbf16, #tpu.memory_space<vmem>>, %arg12: memref<1x64x128xbf16, #tpu.memory_space<vmem>>) attributes {dimension_semantics = [#tpu.dimension_semantics<parallel>], iteration_bounds = array<i64: 4>, scalar_prefetch = 0 : i64, scratch_operands = 2 : i64, tpu.core_type = #tpu.core_type<tc>, window_params = [{transform_indices = @transform_0, window_bounds = array<i64: 1, 64, 128>}, {pipeline_mode = #tpu.pipeline_mode<synchronous>, transform_indices = @transform_1, window_bounds = array<i64: 1, 128>}, {pipeline_mode = #tpu.pipeline_mode<synchronous>, transform_indices = @transform_2, window_bounds = array<i64: 1, 128>}, {pipeline_mode = #tpu.pipeline_mode<synchronous>, transform_indices = @transform_3, window_bounds = array<i64: 128, 128>}, {pipeline_mode = #tpu.pipeline_mode<synchronous>, transform_indices = @transform_4, window_bounds = array<i64: 1, 128>}, {pipeline_mode = #tpu.pipeline_mode<synchronous>, transform_indices = @transform_5, window_bounds = array<i64: 128, 256>}, {pipeline_mode = #tpu.pipeline_mode<synchronous>, transform_indices = @transform_6, window_bounds = array<i64: 1, 128>}, {pipeline_mode = #tpu.pipeline_mode<synchronous>, transform_indices = @transform_7, window_bounds = array<i64: 128, 128>}, {pipeline_mode = #tpu.pipeline_mode<synchronous>, transform_indices = @transform_8, window_bounds = array<i64: 1, 128>}, {transform_indices = @transform_9, window_bounds = array<i64: 1, 64, 128>}]} {
    %c0 = arith.constant 0 : index
    %c0_0 = arith.constant 0 : index
    %c0_1 = arith.constant 0 : index
    %0 = vector.load %arg1[%c0, %c0_0, %c0_1] : memref<1x64x128xf32, #tpu.memory_space<vmem>>, vector<1x64x128xf32>
    %cst = arith.constant dense<0.000000e+00> : vector<1x64xf32>
    %1 = vector.multi_reduction <add>, %0, %cst [2] : vector<1x64x128xf32> to vector<1x64xf32>
    %2 = vector.shape_cast %1 : vector<1x64xf32> to vector<1x64x1xf32>
    %cst_2 = arith.constant dense<0.000000e+00> : vector<1x1xf32>
    %3 = vector.multi_reduction <add>, %2, %cst_2 [1] : vector<1x64x1xf32> to vector<1x1xf32>
    %4 = vector.shape_cast %3 : vector<1x1xf32> to vector<1x1x1xf32>
    %cst_3 = arith.constant 1.22070313E-4 : f32
    %5 = vector.broadcast %cst_3 : f32 to vector<1x1x1xf32>
    %6 = arith.mulf %4, %5 : vector<1x1x1xf32>
    %7 = vector.broadcast %6 : vector<1x1x1xf32> to vector<1x64x128xf32>
    %8 = arith.subf %0, %7 : vector<1x64x128xf32>
    %9 = arith.mulf %8, %8 : vector<1x64x128xf32>
    %cst_4 = arith.constant dense<0.000000e+00> : vector<1x64xf32>
    %10 = vector.multi_reduction <add>, %9, %cst_4 [2] : vector<1x64x128xf32> to vector<1x64xf32>
    %11 = vector.shape_cast %10 : vector<1x64xf32> to vector<1x64x1xf32>
    %cst_5 = arith.constant dense<0.000000e+00> : vector<1x1xf32>
    %12 = vector.multi_reduction <add>, %11, %cst_5 [1] : vector<1x64x1xf32> to vector<1x1xf32>
    %13 = vector.shape_cast %12 : vector<1x1xf32> to vector<1x1x1xf32>
    %cst_6 = arith.constant 1.22070313E-4 : f32
    %14 = vector.broadcast %cst_6 : f32 to vector<1x1x1xf32>
    %15 = arith.mulf %13, %14 : vector<1x1x1xf32>
    %cst_7 = arith.constant 9.99999997E-7 : f32
    %16 = vector.broadcast %cst_7 : f32 to vector<1x1x1xf32>
    %17 = arith.addf %15, %16 : vector<1x1x1xf32>
    %18 = math.rsqrt %17 : vector<1x1x1xf32>
    %c0_8 = arith.constant 0 : index
    %c0_9 = arith.constant 0 : index
    %19 = vector.load %arg2[%c0_8, %c0_9] : memref<1x128xf32, #tpu.memory_space<vmem>>, vector<1x128xf32>
    %20 = vector.shape_cast %19 : vector<1x128xf32> to vector<128xf32>
    %c0_10 = arith.constant 0 : index
    %c0_11 = arith.constant 0 : index
    %21 = vector.load %arg3[%c0_10, %c0_11] : memref<1x128xf32, #tpu.memory_space<vmem>>, vector<1x128xf32>
    %22 = vector.shape_cast %21 : vector<1x128xf32> to vector<128xf32>
    %23 = vector.shape_cast %20 : vector<128xf32> to vector<1x1x128xf32>
    %24 = vector.broadcast %18 : vector<1x1x1xf32> to vector<1x1x128xf32>
    %25 = arith.mulf %24, %23 : vector<1x1x128xf32>
    %26 = vector.broadcast %6 : vector<1x1x1xf32> to vector<1x1x128xf32>
    %27 = arith.mulf %26, %25 : vector<1x1x128xf32>
    %28 = vector.shape_cast %22 : vector<128xf32> to vector<1x1x128xf32>
    %29 = arith.subf %28, %27 : vector<1x1x128xf32>
    %30 = vector.broadcast %25 : vector<1x1x128xf32> to vector<1x64x128xf32>
    %31 = arith.mulf %8, %30 : vector<1x64x128xf32>
    %32 = vector.shape_cast %22 : vector<128xf32> to vector<1x1x128xf32>
    %33 = vector.broadcast %32 : vector<1x1x128xf32> to vector<1x64x128xf32>
    %34 = arith.addf %31, %33 : vector<1x64x128xf32>
    %35 = arith.truncf %34 : vector<1x64x128xf32> to vector<1x64x128xbf16>
    %36 = vector.shape_cast %35 : vector<1x64x128xbf16> to vector<64x128xbf16>
    %c0_12 = arith.constant 0 : index
    %c0_13 = arith.constant 0 : index
    %37 = vector.load %arg6[%c0_12, %c0_13] : memref<128x256xbf16, #tpu.memory_space<vmem>>, vector<128x256xbf16>
    %cst_14 = arith.constant dense<0.000000e+00> : vector<64x256xf32>
    %38 = tpu.matmul %36, %37, %cst_14 {dimension_numbers = #tpu.dot_dimension_numbers<[1], [0], [0], [1], [0, 0, 1, 1], [], []>} : vector<64x128xbf16>, vector<128x256xbf16>, vector<64x256xf32> -> vector<64x256xf32>
    %39 = vector.extract_strided_slice %38 {offsets = [0, 0], sizes = [64, 128], strides = [1, 1]} : vector<64x256xf32> to vector<64x128xf32>
    %40 = arith.truncf %39 : vector<64x128xf32> to vector<64x128xbf16>
    %41 = vector.shape_cast %40 : vector<64x128xbf16> to vector<1x64x128xbf16>
    %c0_15 = arith.constant 0 : index
    %c0_16 = arith.constant 0 : index
    %c0_17 = arith.constant 0 : index
    %42 = vector.load %arg11[%c0_15, %c0_16, %c0_17] : memref<1x64x128xbf16, #tpu.memory_space<vmem>>, vector<1x64x128xbf16>
    tpu.vector_store %arg11[%c0_15, %c0_16, %c0_17], %41 {strides = array<i32>} : memref<1x64x128xbf16, #tpu.memory_space<vmem>>, vector<1x64x128xbf16>,
    %43 = vector.extract_strided_slice %38 {offsets = [0, 128], sizes = [64, 128], strides = [1, 1]} : vector<64x256xf32> to vector<64x128xf32>
    %c0_18 = arith.constant 0 : index
    %c0_19 = arith.constant 0 : index
    %44 = vector.load %arg7[%c0_18, %c0_19] : memref<1x128xf32, #tpu.memory_space<vmem>>, vector<1x128xf32>
    %45 = vector.shape_cast %44 : vector<1x128xf32> to vector<128xf32>
    %46 = vector.shape_cast %45 : vector<128xf32> to vector<1x128xf32>
    %47 = vector.broadcast %46 : vector<1x128xf32> to vector<64x128xf32>
    %48 = arith.addf %43, %47 : vector<64x128xf32>
    %49 = arith.truncf %48 : vector<64x128xf32> to vector<64x128xbf16>
    %50 = vector.shape_cast %49 : vector<64x128xbf16> to vector<1x64x128xbf16>
    %c0_20 = arith.constant 0 : index
    %c0_21 = arith.constant 0 : index
    %c0_22 = arith.constant 0 : index
    %51 = vector.load %arg12[%c0_20, %c0_21, %c0_22] : memref<1x64x128xbf16, #tpu.memory_space<vmem>>, vector<1x64x128xbf16>
    tpu.vector_store %arg12[%c0_20, %c0_21, %c0_22], %50 {strides = array<i32>} : memref<1x64x128xbf16, #tpu.memory_space<vmem>>, vector<1x64x128xbf16>,
    %c0_23 = arith.constant 0 : index
    %c0_24 = arith.constant 0 : index
    %c0_25 = arith.constant 0 : index
    %52 = vector.load %arg1[%c0_23, %c0_24, %c0_25] : memref<1x64x128xf32, #tpu.memory_space<vmem>>, vector<1x64x128xf32>
    %53 = vector.broadcast %25 : vector<1x1x128xf32> to vector<1x64x128xf32>
    %54 = arith.mulf %52, %53 : vector<1x64x128xf32>
    %55 = vector.broadcast %29 : vector<1x1x128xf32> to vector<1x64x128xf32>
    %56 = arith.addf %54, %55 : vector<1x64x128xf32>
    %57 = arith.truncf %56 : vector<1x64x128xf32> to vector<1x64x128xbf16>
    %58 = vector.shape_cast %57 : vector<1x64x128xbf16> to vector<64x128xbf16>
    %c0_26 = arith.constant 0 : index
    %c0_27 = arith.constant 0 : index
    %59 = vector.load %arg4[%c0_26, %c0_27] : memref<128x128xbf16, #tpu.memory_space<vmem>>, vector<128x128xbf16>
    %cst_28 = arith.constant dense<0.000000e+00> : vector<64x128xf32>
    %60 = tpu.matmul %58, %59, %cst_28 {dimension_numbers = #tpu.dot_dimension_numbers<[1], [0], [0], [1], [0, 0, 1, 1], [], []>} : vector<64x128xbf16>, vector<128x128xbf16>, vector<64x128xf32> -> vector<64x128xf32>
    %c0_29 = arith.constant 0 : index
    %c0_30 = arith.constant 0 : index
    %61 = vector.load %arg5[%c0_29, %c0_30] : memref<1x128xf32, #tpu.memory_space<vmem>>, vector<1x128xf32>
    %62 = vector.shape_cast %61 : vector<1x128xf32> to vector<128xf32>
    %63 = vector.shape_cast %62 : vector<128xf32> to vector<1x128xf32>
    %64 = vector.broadcast %63 : vector<1x128xf32> to vector<64x128xf32>
    %65 = arith.addf %60, %64 : vector<64x128xf32>
    %66 = vector.shape_cast %65 : vector<64x128xf32> to vector<1x64x128xf32>
    %67 = arith.truncf %66 : vector<1x64x128xf32> to vector<1x64x128xbf16>
    %cst_31 = arith.constant 0xFF800000 : f32
    %68 = vector.broadcast %cst_31 : f32 to vector<1x64x1xf32>
    %cst_32 = arith.constant 0.000000e+00 : f32
    %69 = vector.broadcast %cst_32 : f32 to vector<1x64x1xf32>
    %cst_33 = arith.constant 0.000000e+00 : f32
    %70 = vector.broadcast %cst_33 : f32 to vector<1x64x128xf32>
    %c0_34 = arith.constant 0 : index
    %c0_35 = arith.constant 0 : index
    %c0_36 = arith.constant 0 : index
    %71 = vector.load %arg11[%c0_34, %c0_35, %c0_36] : memref<1x64x128xbf16, #tpu.memory_space<vmem>>, vector<1x64x128xbf16>
    %c0_37 = arith.constant 0 : index
    %c0_38 = arith.constant 0 : index
    %c0_39 = arith.constant 0 : index
    %72 = vector.load %arg12[%c0_37, %c0_38, %c0_39] : memref<1x64x128xbf16, #tpu.memory_space<vmem>>, vector<1x64x128xbf16>
    "tpu.trace_start"() <{level = 10 : i32, message = "bqd,bkd->bqk"}> : () -> ()
    %cst_40 = arith.constant dense<0.000000e+00> : vector<1x64x64xf32>
    %73 = tpu.matmul %67, %71, %cst_40 {dimension_numbers = #tpu.dot_dimension_numbers<[2], [2], [1], [1], [0, 0, 0, 1, 1, 1], [0], [0]>} : vector<1x64x128xbf16>, vector<1x64x128xbf16>, vector<1x64x64xf32> -> vector<1x64x64xf32>
    "tpu.trace_stop"() : () -> ()
    %cst_41 = arith.constant dense<0xFF800000> : vector<1x64xf32>
    %74 = vector.multi_reduction <maximumf>, %73, %cst_41 [2] : vector<1x64x64xf32> to vector<1x64xf32>
    %75 = vector.shape_cast %74 : vector<1x64xf32> to vector<1x64x1xf32>
    %76 = arith.maximumf %68, %75 : vector<1x64x1xf32>
    %77 = arith.subf %68, %76 : vector<1x64x1xf32>
    %78 = math.exp %77 : vector<1x64x1xf32>
    %79 = vector.broadcast %76 : vector<1x64x1xf32> to vector<1x64x64xf32>
    %80 = arith.subf %73, %79 : vector<1x64x64xf32>
    %81 = math.exp %80 : vector<1x64x64xf32>
    %82 = arith.mulf %78, %69 : vector<1x64x1xf32>
    %cst_42 = arith.constant dense<0.000000e+00> : vector<1x64xf32>
    %83 = vector.multi_reduction <add>, %81, %cst_42 [2] : vector<1x64x64xf32> to vector<1x64xf32>
    %84 = vector.shape_cast %83 : vector<1x64xf32> to vector<1x64x1xf32>
    %85 = arith.addf %82, %84 : vector<1x64x1xf32>
    %86 = vector.broadcast %78 : vector<1x64x1xf32> to vector<1x64x128xf32>
    %87 = arith.mulf %86, %70 : vector<1x64x128xf32>
    %88 = arith.truncf %81 : vector<1x64x64xf32> to vector<1x64x64xbf16>
    "tpu.trace_start"() <{level = 10 : i32, message = "bqk,bkd->bqd"}> : () -> ()
    %cst_43 = arith.constant dense<0.000000e+00> : vector<1x64x128xf32>
    %89 = tpu.matmul %88, %72, %cst_43 {dimension_numbers = #tpu.dot_dimension_numbers<[2], [1], [1], [2], [0, 0, 0, 1, 1, 2], [0], [0]>} : vector<1x64x64xbf16>, vector<1x64x128xbf16>, vector<1x64x128xf32> -> vector<1x64x128xf32>
    "tpu.trace_stop"() : () -> ()
    %90 = arith.addf %87, %89 : vector<1x64x128xf32>
    %91 = tpu.reciprocal %85 {approx = true} : vector<1x64x1xf32> -> vector<1x64x1xf32>
    %92 = vector.broadcast %91 : vector<1x64x1xf32> to vector<1x64x128xf32>
    %93 = arith.mulf %90, %92 : vector<1x64x128xf32>
    %94 = vector.shape_cast %93 : vector<1x64x128xf32> to vector<64x128xf32>
    %95 = arith.truncf %94 : vector<64x128xf32> to vector<64x128xbf16>
    %c0_44 = arith.constant 0 : index
    %c0_45 = arith.constant 0 : index
    %96 = vector.load %arg8[%c0_44, %c0_45] : memref<128x128xbf16, #tpu.memory_space<vmem>>, vector<128x128xbf16>
    %cst_46 = arith.constant dense<0.000000e+00> : vector<64x128xf32>
    %97 = tpu.matmul %95, %96, %cst_46 {dimension_numbers = #tpu.dot_dimension_numbers<[1], [0], [0], [1], [0, 0, 1, 1], [], []>} : vector<64x128xbf16>, vector<128x128xbf16>, vector<64x128xf32> -> vector<64x128xf32>
    %c0_47 = arith.constant 0 : index
    %c0_48 = arith.constant 0 : index
    %98 = vector.load %arg9[%c0_47, %c0_48] : memref<1x128xf32, #tpu.memory_space<vmem>>, vector<1x128xf32>
    %99 = vector.shape_cast %98 : vector<1x128xf32> to vector<128xf32>
    %100 = vector.shape_cast %99 : vector<128xf32> to vector<1x128xf32>
    %101 = vector.broadcast %100 : vector<1x128xf32> to vector<64x128xf32>
    %102 = arith.addf %97, %101 : vector<64x128xf32>
    %103 = vector.shape_cast %102 : vector<64x128xf32> to vector<1x64x128xf32>
    %104 = arith.addf %103, %52 : vector<1x64x128xf32>
    %c0_49 = arith.constant 0 : index
    %c0_50 = arith.constant 0 : index
    %c0_51 = arith.constant 0 : index
    %105 = vector.load %arg10[%c0_49, %c0_50, %c0_51] : memref<1x64x128xf32, #tpu.memory_space<vmem>>, vector<1x64x128xf32>
    tpu.vector_store %arg10[%c0_49, %c0_50, %c0_51], %104 {strides = array<i32>} : memref<1x64x128xf32, #tpu.memory_space<vmem>>, vector<1x64x128xf32>,
    return
  }
  func.func @transform_0(%arg0: i32) -> (i32, i32, i32) {
    %c0_i32 = arith.constant 0 : i32
    %c0_i32_0 = arith.constant 0 : i32
    %c0_i32_1 = arith.constant 0 : i32
    return %arg0, %c0_i32, %c0_i32_0 : i32, i32, i32
  }
  func.func @transform_1(%arg0: i32) -> (i32, i32) {
    %c0_i32 = arith.constant 0 : i32
    %c0_i32_0 = arith.constant 0 : i32
    %c0_i32_1 = arith.constant 0 : i32
    return %c0_i32, %c0_i32_0 : i32, i32
  }
  func.func @transform_2(%arg0: i32) -> (i32, i32) {
    %c0_i32 = arith.constant 0 : i32
    %c0_i32_0 = arith.constant 0 : i32
    %c0_i32_1 = arith.constant 0 : i32
    return %c0_i32, %c0_i32_0 : i32, i32
  }
  func.func @transform_3(%arg0: i32) -> (i32, i32) {
    %c0_i32 = arith.constant 0 : i32
    %c0_i32_0 = arith.constant 0 : i32
    %c0_i32_1 = arith.constant 0 : i32
    return %c0_i32, %c0_i32_0 : i32, i32
  }
  func.func @transform_4(%arg0: i32) -> (i32, i32) {
    %c0_i32 = arith.constant 0 : i32
    %c0_i32_0 = arith.constant 0 : i32
    %c0_i32_1 = arith.constant 0 : i32
    return %c0_i32, %c0_i32_0 : i32, i32
  }
  func.func @transform_5(%arg0: i32) -> (i32, i32) {
    %c0_i32 = arith.constant 0 : i32
    %c0_i32_0 = arith.constant 0 : i32
    %c0_i32_1 = arith.constant 0 : i32
    return %c0_i32, %c0_i32_0 : i32, i32
  }
  func.func @transform_6(%arg0: i32) -> (i32, i32) {
    %c0_i32 = arith.constant 0 : i32
    %c0_i32_0 = arith.constant 0 : i32
    %c0_i32_1 = arith.constant 0 : i32
    return %c0_i32, %c0_i32_0 : i32, i32
  }
  func.func @transform_7(%arg0: i32) -> (i32, i32) {
    %c0_i32 = arith.constant 0 : i32
    %c0_i32_0 = arith.constant 0 : i32
    %c0_i32_1 = arith.constant 0 : i32
    return %c0_i32, %c0_i32_0 : i32, i32
  }
  func.func @transform_8(%arg0: i32) -> (i32, i32) {
    %c0_i32 = arith.constant 0 : i32
    %c0_i32_0 = arith.constant 0 : i32
    %c0_i32_1 = arith.constant 0 : i32
    return %c0_i32, %c0_i32_0 : i32, i32
  }
  func.func @transform_9(%arg0: i32) -> (i32, i32, i32) {
    %c0_i32 = arith.constant 0 : i32
    %c0_i32_0 = arith.constant 0 : i32
    %c0_i32_1 = arith.constant 0 : i32
    return %arg0, %c0_i32, %c0_i32_0 : i32, i32, i32
  }
}

</mosaic_0001>

<bundles_post_ra>
// kernel: tpu_custom_call.1
= control target key start
LH: loop header
LB: loop body
LE: loop exit
PB: predicated region body
PF: predicated region fallthrough
CT: control target
= control target key end

     0   :  { %s2535_s0 = inlined_call_operand.hbm [shape: f32[4,64,128], index: 0, kind: input, shape index: {}]   ;;  %s2536_s1 = inlined_call_operand.vmem [shape: f32[1,128], index: 1, kind: input, shape index: {}]   ;;  %s2537_s2 = inlined_call_operand.vmem [shape: f32[1,128], index: 2, kind: input, shape index: {}]   ;;  %s2538_s3 = inlined_call_operand.hbm [shape: bf16[128,128], index: 3, kind: input, shape index: {}]   ;;  %s2539_s4 = inlined_call_operand.vmem [shape: f32[1,128], index: 4, kind: input, shape index: {}]   ;;  %s2540_s5 = inlined_call_operand.hbm [shape: bf16[128,256], index: 5, kind: input, shape index: {}]   ;;  %s2541_s6 = inlined_call_operand.vmem [shape: f32[1,128], index: 6, kind: input, shape index: {}]   ;;  %s2542_s7 = inlined_call_operand.hbm [shape: bf16[128,128], index: 7, kind: input, shape index: {}]   ;;  %s2543_s8 = inlined_call_operand.vmem [shape: f32[1,128], index: 8, kind: input, shape index: {}]   ;;  %s2544_s9 = inlined_call_operand.hbm [shape: f32[4,64,128], index: 9, kind: output, shape index: {}]  }
   0x1   :  { %2553 = sst [smem:[#allocation19_spill]] %s2538_s3 }
   0x2   :  { %2554 = sst [smem:[#allocation20_spill]] %s2544_s9 }
   0x3   :  { %14 = vsyncpa [#allocation5], 0 }
   0x4   :  { %16 = vsyncpa [#allocation5 + $0x1], 0 }
   0x5   :  { %17 = vsyncpa [#allocation8], 0 }
   0x6   :  { %18 = vsyncpa [#allocation11], 0 }
   0x7   :  { %19 = vsyncpa [#allocation6], 0 }
   0x8   :  { %21 = vsyncpa [#allocation6 + $0x1], 0  ;;  %s2071_s30 = smov 0   ;;  %s2073_s10 = smov 0  }
   0x9   :  { %s2075_s11 = smov 0   ;;  %s2077_s12 = smov 0  }
   0xa LB: > { %2555 = sst [smem:[#allocation17_spill]] %s1995_s30  ;;  %s2092_s13 = sadd.s32 4294967295, %s2007_s12   ;;  %s2007_s12 = sphi %s2077_s12, %s2581_s12   ;;  %s2003_s11 = sphi %s2075_s11, %s2580_s11   ;;  %s1999_s10 = sphi %s2073_s10, %s2579_s10   ;;  %s1995_s30 = sphi %s2071_s30, %s2578_s30  }
   0xb   : > { %s1456_s14 = sadd.s32 4294967294, %s2007_s12   ;;  %p47_p0 = scmp.ne.s32.totalorder %s1999_s10, %s1995_s30 }
   0xc   : > { %p2545_p1 = scmp.eq.s32.totalorder %s2092_s13, 0  ;;  %p245_p3 = scmp.eq.s32.totalorder %s1456_s14, 3 }
   0xd   : > { %p1457_p5 = scmp.ge.s32.totalorder %s2007_s12, 1  ;;  %p252_p7 = scmp.lt.s32.totalorder %s2007_s12, 5 }
   0xe   : > { %p2101_p4 = por %p2545_p1, %p47_p0  ;;  %p2106_p6 = por %p245_p3, %p47_p0 }
   0xf   : > { %p2111_p8 = pnand %p1457_p5, %p252_p7  ;;  %s2009_s18 = smov [#allocation7]  }
  0x10   : > { %s2556_s15 = scalar_select %p2101_p4, 1, 0 }
  0x11   : > { %s2557_s16 = scalar_select %p2106_p6, 1, 0 }
  0x12   : > { %s2559_s17 = scalar_select %p2111_p8, 1, 0 }
  0x13   : > { %2558 = sst [smem:[#allocation18_spill]] %s2557_s16  ;;  %s270_s19 = sshll.u32 %s2009_s18, 4  ;;  %s271_s19 = int_to_ptr.vmem [resolvable:$true] %s270_s19 }
  0x14   : > { %p1653_p9 = pneg %p2111_p8  ;;  %s2010_s21 = smov [#allocation9]  }
  0x15   : > { %s286_s22 = sshll.u32 %s2010_s21, 4  ;;  %s2561_s3 = sld [smem:[#allocation19_spill]]  ;;  %s2123_s22 = int_to_ptr.vmem [resolvable:$true] %s286_s22 }
  0x16   : > { %p2119_p10 = pnand %p1653_p9, %p2545_p1 }
  0x18   : > { %p2133_p12 = pneg %p2119_p10 }
  0x1b   : > { %s1819_s25 = scalar_lea.hbm %s2561_s3, 1024 }
  0x1c   : > { %p1820_p11 = scmp.ne.s32.totalorder %s2561_s3, %s1819_s25  ;;  %p1826_p3 = scmp.lt.u32.totalorder %s1819_s25, %s2561_s3 }
  0x1e   : > { %p1822_p13 = pnand %p2133_p12, %p1820_p11 }
  0x20   : > { %p1823_p0 = pneg %p1822_p13 }
  0x22   : > { %p1828_p5 = pnand %p1826_p3, %p1823_p0 }
  0x24   : > { %1831 = shalt.err (!%p1828_p5)
}
  0x25   : > { %s1832_s18 = scalar_lea.vmem %s271_s19, 1024  ;;  %p1840_p2 = scmp.lt.s32.totalorder %s271_s19, %s271_s19 }
  0x26   : > { %p1833_p7 = scmp.ne.s32.totalorder %s271_s19, %s1832_s18  ;;  %p1841_p6 = scmp.lt.s32.totalorder %s1832_s18, %s1832_s18 }
  0x28   : > { %p1835_p9 = pnand %p1833_p7, %p2133_p12  ;;  %p1842_p4 = por %p1841_p6, %p1840_p2 }
  0x2a   : > { %p1836_p1 = pneg %p1835_p9 }
  0x2c   : > { %p1843_p8 = pnand %p1842_p4, %p1836_p1 }
  0x2e   : > { %1846 = shalt.err (!%p1843_p8)
}
  0x2f   : > { %s2550_s21 = smov 64   ;;  %s2551_s23 = smov 4  }
  0x30   : > { %1656 = dma.hbm_to_vmem [thread:$0]  (!%p2119_p10), %s2561_s3, 1024, %s271_s19, [#allocation8], %s2550_s21, %s2550_s21, %s2551_s23  }
  0x31   : > { %s1847_s29 = scalar_lea.hbm %s2540_s5, 2048 }
  0x32   : > { %p1848_p1 = scmp.ne.s32.totalorder %s2540_s5, %s1847_s29  ;;  %p1854_p6 = scmp.lt.u32.totalorder %s1847_s29, %s2540_s5 }
  0x34   : > { %p1850_p2 = pnand %p1848_p1, %p2133_p12 }
  0x36   : > { %p1851_p4 = pneg %p1850_p2 }
  0x38   : > { %p1856_p8 = pnand %p1854_p6, %p1851_p4 }
  0x3a   : > { %1859 = shalt.err (!%p1856_p8)
}
  0x3b   : > { %s1860_s19 = scalar_lea.vmem %s2123_s22, 2048  ;;  %p1868_p3 = scmp.lt.s32.totalorder %s2123_s22, %s2123_s22 }
  0x3c   : > { %p1861_p11 = scmp.ne.s32.totalorder %s2123_s22, %s1860_s19  ;;  %p1869_p5 = scmp.lt.s32.totalorder %s1860_s19, %s1860_s19 }
  0x3e   : > { %p1863_p13 = pnand %p1861_p11, %p2133_p12  ;;  %p1870_p7 = por %p1869_p5, %p1868_p3 }
  0x40   : > { %p1864_p0 = pneg %p1863_p13 }
  0x42   : > { %p1871_p9 = pnand %p1870_p7, %p1864_p0 }
  0x44   : > { %1874 = shalt.err (!%p1871_p9)
}
  0x45   : > { %s2013_s24 = smov 128   ;;  %s2014_s30 = smov 8  }
  0x46   : > { %1659 = dma.hbm_to_vmem [thread:$0]  (!%p2119_p10), %s2540_s5, 2048, %s2123_s22, [#allocation8], %s2013_s24, %s2013_s24, %s2014_s30  }
  0x47   : > { %s2015_s26 = smov [#allocation10]   ;;  %s2179_s29 = sadd.s32 1, %s2007_s12  }
  0x48   : > { %s302_s27 = sshll.u32 %s2015_s26, 4  ;;  %s1875_s19 = scalar_lea.hbm %s2542_s7, 1024  ;;  %s303_s27 = int_to_ptr.vmem [resolvable:$true] %s302_s27 }
  0x49   : > { %p1876_p1 = scmp.ne.s32.totalorder %s2542_s7, %s1875_s19  ;;  %p1882_p6 = scmp.lt.u32.totalorder %s1875_s19, %s2542_s7 }
  0x4b   : > { %p1878_p2 = pnand %p1876_p1, %p2133_p12 }
  0x4d   : > { %p1879_p4 = pneg %p1878_p2 }
  0x4f   : > { %p1884_p8 = pnand %p1882_p6, %p1879_p4 }
  0x51   : > { %1887 = shalt.err (!%p1884_p8)
}
  0x52   : > { %s1888_s22 = scalar_lea.vmem %s303_s27, 1024  ;;  %p1896_p3 = scmp.lt.s32.totalorder %s303_s27, %s303_s27 }
  0x53   : > { %p1889_p11 = scmp.ne.s32.totalorder %s303_s27, %s1888_s22  ;;  %p1897_p5 = scmp.lt.s32.totalorder %s1888_s22, %s1888_s22 }
  0x55   : > { %p1891_p13 = pnand %p1889_p11, %p2133_p12  ;;  %p1898_p7 = por %p1897_p5, %p1896_p3 }
  0x57   : > { %p1892_p0 = pneg %p1891_p13 }
  0x59   : > { %p1899_p9 = pnand %p1898_p7, %p1892_p0 }
  0x5b   : > { %1902 = shalt.err (!%p1899_p9)
}
  0x5c   : > { %s2563_s21 = smov 4   ;;  %s2564_s23 = smov 64  }
  0x5d   : > { %1662 = dma.hbm_to_vmem [thread:$0]  (!%p2119_p10), %s2542_s7, 1024, %s303_s27, [#allocation11], %s2564_s23, %s2564_s23, %s2563_s21  }
  0x5e   : > { %s31_s28 = ssub.s32 %s2007_s12, %s2179_s29  ;;  %s34_s20 = sadd.s32 1, %s2003_s11 }
  0x5f   : > { %p32_p12 = scmp.eq.s32.totalorder %s31_s28, 0  ;;  %p41_p1 = scmp.ne.s32.totalorder %s2003_s11, %s1999_s10 }
  0x60   : > { %p42_p2 = scmp.eq.s32.totalorder %s2007_s12, 0  ;;  %p1674_p4 = scmp.lt.s32.totalorder %s2007_s12, 4 }
  0x61   : > { %s2210_s16 = scalar_select %p32_p12, %s2003_s11, %s34_s20  }
  0x62   : > { %p43_p6 = por %p42_p2, %p41_p1  ;;  %p2565_p8 = scmp.eq.s32.totalorder %s2092_s13, 3 }
  0x63   : > { %s319_s26 = sand.u32 1, %s2003_s11   ;;  %s1515_s14 = sshll.u32 %s2007_s12, 10 }
  0x64   : > { %p2214_p11 = por %p2565_p8, %p41_p1  ;;  %s1462_s18 = sshll.u32 %s319_s26, 6 }
  0x65   : > { %s2223_s27 = scalar_lea.hbm %s2535_s0, %s1515_s14  ;;  %s323_s21 = scalar_lea.vmem [#allocation4], %s1462_s18 }
  0x66   : > { %s330_s23 = sshll.u32 %s323_s21, 4  ;;  %p2225_p10 = pnand %p1674_p4, %p43_p6  ;;  %s2229_s23 = int_to_ptr.vmem [resolvable:$true] %s330_s23 }
  0x67   : > { %s2231_s9 = scalar_lea.sflag [#allocation5], %s319_s26  ;;  %s1903_s28 = scalar_lea.hbm %s2223_s27, 1024 }
  0x68   : > { %p1904_p13 = scmp.ne.s32.totalorder %s2223_s27, %s1903_s28  ;;  %p1905_p0 = pneg %p2225_p10 }
  0x69   : > { %s1908_s18 = scalar_lea.hbm %s2535_s0, 4096  ;;  %p1909_p7 = scmp.lt.u32.totalorder %s2223_s27, %s2535_s0 }
  0x6a   : > { %p1906_p3 = pnand %p1905_p0, %p1904_p13  ;;  %p1910_p9 = scmp.lt.u32.totalorder %s1908_s18, %s1903_s28 }
  0x6b   : > { %p1912_p1 = scmp.lt.u32.totalorder %s1903_s28, %s2223_s27 }
  0x6c   : > { %p1907_p5 = pneg %p1906_p3  ;;  %p1911_p12 = por %p1910_p9, %p1909_p7 }
  0x6e   : > { %p1913_p2 = por %p1912_p1, %p1911_p12 }
  0x70   : > { %p1914_p4 = pnand %p1913_p2, %p1907_p5 }
  0x72   : > { %1917 = shalt.err (!%p1914_p4)
}
  0x73   : > { %s1918_s26 = scalar_lea.vmem %s2229_s23, 1024  ;;  %s2016_s21 = smov [#allocation4]  }
  0x74   : > { %p1919_p6 = scmp.ne.s32.totalorder %s2229_s23, %s1918_s26  ;;  %s1923_s20 = sshll.u32 %s2016_s21, 4  ;;  %s1924_s20 = int_to_ptr.vmem [resolvable:$false] %s1923_s20 }
  0x75   : > { %s1925_s14 = scalar_lea.vmem %s1924_s20, 2048  ;;  %p1926_p3 = scmp.lt.s32.totalorder %s2229_s23, %s1924_s20 }
  0x76   : > { %p1921_p8 = pnand %p1919_p6, %p1905_p0  ;;  %p1927_p7 = scmp.lt.s32.totalorder %s1925_s14, %s1918_s26 }
  0x78   : > { %p1922_p13 = pneg %p1921_p8  ;;  %p1928_p9 = por %p1927_p7, %p1926_p3 }
  0x7a   : > { %p1929_p12 = pnand %p1928_p9, %p1922_p13 }
  0x7c   : > { %1932 = shalt.err (!%p1929_p12)
}
  0x7d   : > { %1666 = dma.hbm_to_vmem [thread:$0]  (!%p2225_p10), %s2223_s27, 1024, %s2229_s23, %s2231_s9, %s2013_s24, %s2013_s24, %s2014_s30  }
  0x7e   : > { %p2568_p0 = scmp.ne.s32.totalorder %s2559_s17, 0 }
  0x7f   : > { %s2265_s28 = sand.u32 (!%p2568_p0), 1, %s1999_s10   ;;  %p2569_p5 = scmp.ne.s32.totalorder (!%p2568_p0), %s2556_s15, 0 }
  0x80   : > { %342 = sbr.rel (%p2568_p0) target bundleno = 1608 (0x648), region = 56  ;;  %s1466_s18 = sshll.u32 (!%p2568_p0), %s2265_s28, 6 }
  0x81   : > { %s345_s19 = scalar_lea.sflag (!%p2568_p0), [#allocation5], %s2265_s28  ;;  %s2271_s3 = scalar_lea.vmem (!%p2568_p0), [#allocation4], %s1466_s18 }
  0x87   : > { %1978 = dma.done.wait (%p2569_p5), %s345_s19, 1024  }
  0x88   : > { %1980 = vsyncadd (%p2569_p5), %s345_s19, 4294966272  ;;  %p2570_p10 = scmp.eq.s32.totalorder %s2092_s13, 0 }
  0x8a   : > { %1982 = dma.done.wait (%p2570_p10), [#allocation8], 3072   ;;  %p2571_p1 = pmov %p2570_p10 }
  0x8c   : > { %1984 = vsyncadd (%p2571_p1), [#allocation8], 4294964224  ;;  %p2572_p2 = pmov %p2571_p1 }
  0x8d   : > { %p2573_p4 = pmov %p2571_p1 }
  0x8e   : > { %1986 = dma.done.wait (%p2572_p2), [#allocation11], 1024  }
  0x8f   : > { %1988 = vsyncadd (%p2573_p4), [#allocation11], 4294966272  ;;  %v2286_v0 = vld [vmem:[%s2271_s3] sm:$0xff]  ;;  %v2289_v1 = vld [vmem:[%s2271_s3 + $0x10] sm:$0xff]  ;;  %vm966_vm0 = vcmask 523264   ;;  %s2469_s20 = scalar_lea.vmem [#allocation12], %s1466_s18 }
  0x90   : > { %404 = vadd.xlane.f32.xlu0 %v2286_v0  ;;  %408 = vadd.xlane.f32.xlu1 %v2289_v1  ;;  %v2294_v2 = vld [vmem:[%s2271_s3 + $0x8] sm:$0xff]  ;;  %v2297_v3 = vld [vmem:[%s2271_s3 + $0x18] sm:$0xff]  ;;  %v2300_v4 = vld [vmem:[%s2271_s3 + $0x20] sm:$0xff]  ;;  %s1354_s14 = sshll.u32 %s2469_s20, 4  ;;  %s1516_s18 = sshll.u32 %s2092_s13, 10  ;;  %s2480_s14 = int_to_ptr.vmem [resolvable:$true] %s1354_s14 }
  0x91   : > { %v2303_v5 = vld [vmem:[%s2271_s3 + $0x28] sm:$0xff]  ;;  %v2308_v6 = vld [vmem:[%s2271_s3 + $0x30] sm:$0xff]  ;;  %v2311_v7 = vld [vmem:[%s2271_s3 + $0x38] sm:$0xff]  ;;  %s2574_s15 = sld [smem:[#allocation20_spill]]  ;;  %s1341_s24 = scalar_lea.sflag [#allocation6], %s2265_s28 }
  0x92   : > { %v1721_v46 = vld [vmem:[#allocation9 + $0x4] ss:$8 sps:$4 sm:$0xff]   ;;  %v1723_v47 = vld [vmem:[#allocation9] ss:$8 sps:$4 sm:$0xff]   ;;  %v1725_v49 = vld [vmem:[#allocation9 + $0x14] ss:$8 sps:$4 sm:$0xff]  }
  0x93   : > { %615 = vmatprep.subr.bf16.mxu0 %v1721_v46  ;;  %v1724_v48 = vld [vmem:[#allocation7] sm:$0xff]   ;;  %v1727_v50 = vld [vmem:[#allocation9 + $0x10] ss:$8 sps:$4 sm:$0xff]   ;;  %v1728_v51 = vld [vmem:[#allocation7 + $0x8] sm:$0xff]   ;;  %s1933_s30 = scalar_lea.vmem %s2480_s14, 1024  ;;  %s2018_s27 = smov [#allocation12]  }
  0x94   : > { %406 = vadd.xlane.f32.xlu0 %v2294_v2  ;;  %410 = vadd.xlane.f32.xlu1 %v2297_v3  ;;  %v1729_v52 = vld [vmem:[#allocation9 + $0x24] ss:$8 sps:$4 sm:$0xff]   ;;  %v1731_v53 = vld [vmem:[#allocation9 + $0x20] ss:$8 sps:$4 sm:$0xff]   ;;  %v1732_v54 = vld [vmem:[#allocation7 + $0x10] sm:$0xff]   ;;  %p1934_p6 = scmp.ne.s32.totalorder %s2480_s14, %s1933_s30  ;;  %s1937_s23 = sshll.u32 %s2018_s27, 4  ;;  %s1938_s23 = int_to_ptr.vmem [resolvable:$false] %s1937_s23 }
  0x95   : > { %616 = vmatpush1.bf16.msra.mxu0 %v1723_v47  ;;  %1557 = vmatprep.subr.bf16.mxu1 %v1724_v48  ;;  %v1733_v55 = vld [vmem:[#allocation9 + $0x34] ss:$8 sps:$4 sm:$0xff]   ;;  %v1735_v56 = vld [vmem:[#allocation9 + $0x30] ss:$8 sps:$4 sm:$0xff]   ;;  %v1737_v58 = vld [vmem:[#allocation9 + $0x44] ss:$8 sps:$4 sm:$0xff]   ;;  %v488_v47 = vlaneseq  ;;  %p1940_p3 = scmp.lt.s32.totalorder %s2480_s14, %s1938_s23 }
  0x96   : > { %617 = vmatprep.subr.bf16.mxu0 %v1725_v49  ;;  %1558 = vmatpush3.bf16.msra.mxu1 %v1724_v48  ;;  %v1736_v57 = vld [vmem:[#allocation7 + $0x18] sm:$0xff]   ;;  %v1739_v59 = vld [vmem:[#allocation9 + $0x40] ss:$8 sps:$4 sm:$0xff]   ;;  %p1935_p8 = pnand %p1934_p6, %p2214_p11  ;;  %s1939_s9 = scalar_lea.vmem %s1938_s23, 2048 }
  0x97   : > { %1559 = vmatprep.subr.bf16.mxu1 %v1728_v51  ;;  %v1740_v60 = vld [vmem:[#allocation7 + $0x20] sm:$0xff]   ;;  %v1741_v61 = vld [vmem:[#allocation9 + $0x54] ss:$8 sps:$4 sm:$0xff]   ;;  %v1743_v62 = vld [vmem:[#allocation9 + $0x50] ss:$8 sps:$4 sm:$0xff]   ;;  %v489_v48 = vshrl.u32 %v488_v47, 7  ;;  %s2488_s17 = scalar_lea.hbm %s2574_s15, %s1516_s18  ;;  %p1941_p7 = scmp.lt.s32.totalorder %s1939_s9, %s1933_s30 }
  0x98   : > { %412 = vadd.xlane.f32.xlu0 %v2300_v4  ;;  %414 = vadd.xlane.f32.xlu1 %v2303_v5  ;;  %v1744_v63 = vld [vmem:[#allocation7 + $0x28] sm:$0xff]   ;;  %v482_v49 = vld [vmem:[%s2536_s1] sm:$0x1]  ;;  %p1936_p13 = pneg %p1935_p8 }
  0x99   : > { %618 = vmatpush1.bf16.msra.mxu0 %v1727_v50  ;;  %v490_v50 = vsub.s32 0, %v489_v48  ;;  %p1942_p9 = por %p1941_p7, %p1940_p3 }
  0x9a   : > { %619 = vmatprep.subr.bf16.mxu0 %v1729_v52  ;;  %1560 = vmatpush3.bf16.msra.mxu1 %v1728_v51  ;;  %v483_v52 = vld [vmem:[%s2537_s2] sm:$0x1] }
  0x9b   : > { %1561 = vmatprep.subr.bf16.mxu1 %v1732_v54  ;;  %p1943_p12 = pnand %p1942_p9, %p1936_p13 }
  0x9c   : > { %416 = vadd.xlane.f32.xlu0 %v2308_v6  ;;  %418 = vadd.xlane.f32.xlu1 %v2311_v7 }
  0x9d   : > { %620 = vmatpush1.bf16.msra.mxu0 %v1731_v53 }
  0x9e   : > { %621 = vmatprep.subr.bf16.mxu0 %v1733_v55  ;;  %1562 = vmatpush3.bf16.msra.mxu1 %v1732_v54  ;;  %v505_v54 = vrot.slane %v483_v52, %v490_v50 }
  0x9f   : > { %1563 = vmatprep.subr.bf16.mxu1 %v1736_v57 }
  0xa1   : > { %622 = vmatpush1.bf16.msra.mxu0 %v1735_v56 }
  0xa2   : > { %623 = vmatprep.subr.bf16.mxu0 %v1737_v58  ;;  %1564 = vmatpush3.bf16.msra.mxu1 %v1736_v57 }
  0xa3   : > { %1565 = vmatprep.subr.bf16.mxu1 %v1740_v60 }
  0xa5   : > { %624 = vmatpush1.bf16.msra.mxu0 %v1739_v59 }
  0xa6   : > { %625 = vmatprep.subr.bf16.mxu0 %v1741_v61  ;;  %1566 = vmatpush3.bf16.msra.mxu1 %v1740_v60 }
  0xa7   : > { %1567 = vmatprep.subr.bf16.mxu1 %v1744_v63 }
  0xa9   : > { %626 = vmatpush1.bf16.msra.mxu0 %v1743_v62 }
  0xaa   : > { %1568 = vmatpush3.bf16.msra.mxu1 %v1744_v63 }
 0x11d   : > { %v405_v8 = vpop.xlane.xlu0 %404  ;;  %v409_v9 = vpop.xlane.xlu1 %408 }
 0x121   : > { %v407_v10 = vpop.xlane.xlu0 %406  ;;  %v411_v11 = vpop.xlane.xlu1 %410 }
 0x122   : > { %v420_v12 = vadd.f32 %v407_v10, %v405_v8  ;;  %v1745_v8 = vld [vmem:[#allocation9 + $0x64] ss:$8 sps:$4 sm:$0xff]   ;;  %v1748_v10 = vld [vmem:[#allocation7 + $0x30] sm:$0xff]  }
 0x123   : > { %627 = vmatprep.subr.bf16.mxu0 %v1745_v8  ;;  %1569 = vmatprep.subr.bf16.mxu1 %v1748_v10 }
 0x124   : > { %v421_v13 = vadd.f32 %v420_v12, %v409_v9  ;;  %v1747_v9 = vld [vmem:[#allocation9 + $0x60] ss:$8 sps:$4 sm:$0xff]   ;;  %v1751_v12 = vld [vmem:[#allocation9 + $0x70] ss:$8 sps:$4 sm:$0xff]   ;;  %1570 = vmatpush3.bf16.msra.mxu1 %v1748_v10 }
 0x125   : > { %v413_v14 = vpop.xlane.xlu0 %412  ;;  %v415_v15 = vpop.xlane.xlu1 %414  ;;  %628 = vmatpush1.bf16.msra.mxu0 %v1747_v9 }
 0x126   : > { %v422_v16 = vadd.f32 %v421_v13, %v411_v11  ;;  %v1749_v11 = vld [vmem:[#allocation9 + $0x74] ss:$8 sps:$4 sm:$0xff]  }
 0x127   : > { %v1752_v13 = vld [vmem:[#allocation7 + $0x38] sm:$0xff]   ;;  %629 = vmatprep.subr.bf16.mxu0 %v1749_v11 }
 0x128   : > { %v423_v17 = vadd.f32 %v422_v16, %v413_v14  ;;  %v2017_v14 = vmov 0   ;;  %1571 = vmatprep.subr.bf16.mxu1 %v1752_v13 }
 0x129   : > { %v417_v18 = vpop.xlane.xlu0 %416  ;;  %v419_v20 = vpop.xlane.xlu1 %418  ;;  %630 = vmatpush1.bf16.msra.mxu0 %v1751_v12  ;;  %647 = vmatprep.mubr.bf16.mxu0 %v2017_v14 }
 0x12a   : > { %v424_v19 = vadd.f32 %v423_v17, %v415_v15  ;;  %1572 = vmatpush3.bf16.msra.mxu1 %v1752_v13 }
 0x12c   : > { %v425_v21 = vadd.f32 %v424_v19, %v417_v18 }
 0x12e   : > { %v426_v22 = vadd.f32 %v425_v21, %v419_v20 }
 0x130   : > { %v427_v23 = vrot.slane %v426_v22, 4 }
 0x132   : > { %v428_v24 = vadd.f32 %v427_v23, %v426_v22 }
 0x134   : > { %v429_v25 = vrot.slane %v428_v24, 2 }
 0x136   : > { %v430_v26 = vadd.f32 %v429_v25, %v428_v24 }
 0x138   : > { %v431_v27 = vrot.slane %v430_v26, 1 }
 0x13a   : > { %v432_v28 = vadd.f32 %v431_v27, %v430_v26 }
 0x13c   : > { %v2317_v29 = vmul.f32 0.00012207031, %v432_v28 }
 0x13e   : > { %v2321_v30 = vsub.f32 %v2294_v2, %v2317_v29  ;;  %v2325_v31 = vsub.f32 %v2286_v0, %v2317_v29  ;;  %v2333_v34 = vsub.f32 %v2297_v3, %v2317_v29  ;;  %v2337_v35 = vsub.f32 %v2289_v1, %v2317_v29 }
 0x13f   : > { %v2345_v38 = vsub.f32 %v2303_v5, %v2317_v29  ;;  %v2349_v39 = vsub.f32 %v2300_v4, %v2317_v29  ;;  %v2357_v42 = vsub.f32 %v2311_v7, %v2317_v29  ;;  %v2361_v43 = vsub.f32 %v2308_v6, %v2317_v29 }
 0x140   : > { %v443_v32 = vmul.f32 %v2321_v30, %v2321_v30  ;;  %v442_v33 = vmul.f32 %v2325_v31, %v2325_v31  ;;  %v445_v36 = vmul.f32 %v2333_v34, %v2333_v34  ;;  %v444_v37 = vmul.f32 %v2337_v35, %v2337_v35 }
 0x141   : > { %v447_v40 = vmul.f32 %v2345_v38, %v2345_v38  ;;  %v446_v41 = vmul.f32 %v2349_v39, %v2349_v39  ;;  %v449_v44 = vmul.f32 %v2357_v42, %v2357_v42  ;;  %v448_v45 = vmul.f32 %v2361_v43, %v2361_v43 }
 0x142   : > { %452 = vadd.xlane.f32.xlu1 %v443_v32  ;;  %450 = vadd.xlane.f32.xlu0 %v442_v33 }
 0x146   : > { %456 = vadd.xlane.f32.xlu1 %v445_v36  ;;  %454 = vadd.xlane.f32.xlu0 %v444_v37 }
 0x14a   : > { %460 = vadd.xlane.f32.xlu1 %v447_v40  ;;  %458 = vadd.xlane.f32.xlu0 %v446_v41 }
 0x14e   : > { %464 = vadd.xlane.f32.xlu1 %v449_v44  ;;  %462 = vadd.xlane.f32.xlu0 %v448_v45 }
 0x1cf   : > { %v453_v15 = vpop.xlane.xlu1 %452  ;;  %v451_v16 = vpop.xlane.xlu0 %450 }
 0x1d0   : > { %v466_v17 = vadd.f32 %v453_v15, %v451_v16 }
 0x1d3   : > { %v457_v18 = vpop.xlane.xlu1 %456  ;;  %v455_v19 = vpop.xlane.xlu0 %454 }
 0x1d4   : > { %v467_v20 = vadd.f32 %v466_v17, %v455_v19 }
 0x1d6   : > { %v468_v21 = vadd.f32 %v467_v20, %v457_v18 }
 0x1d7   : > { %v461_v22 = vpop.xlane.xlu1 %460  ;;  %v459_v23 = vpop.xlane.xlu0 %458 }
 0x1d8   : > { %v469_v24 = vadd.f32 %v468_v21, %v459_v23 }
 0x1da   : > { %v470_v25 = vadd.f32 %v469_v24, %v461_v22 }
 0x1db   : > { %v463_v26 = vpop.xlane.xlu0 %462  ;;  %v465_v28 = vpop.xlane.xlu1 %464 }
 0x1dc   : > { %v471_v27 = vadd.f32 %v470_v25, %v463_v26 }
 0x1de   : > { %v472_v32 = vadd.f32 %v471_v27, %v465_v28 }
 0x1e0   : > { %v473_v33 = vrot.slane %v472_v32, 4 }
 0x1e2   : > { %v474_v36 = vadd.f32 %v473_v33, %v472_v32 }
 0x1e4   : > { %v475_v37 = vrot.slane %v474_v36, 2 }
 0x1e6   : > { %v476_v40 = vadd.f32 %v475_v37, %v474_v36  ;;  %v2397_v36 = vld [vmem:[%s2541_s6] ss:$0 sm:$0xff] }
 0x1e8   : > { %v477_v41 = vrot.slane %v476_v40, 1 }
 0x1ea   : > { %v478_v44 = vadd.f32 %v477_v41, %v476_v40 }
 0x1ec   : > { %v479_v45 = vmul.f32 0.00012207031, %v478_v44 }
 0x1ee   : > { %v480_v46 = vadd.f32 1e-06, %v479_v45 }
 0x1f0   : > { %1761 = vrsqrt.f32 %v480_v46 }
 0x1fa   : > { %v1762_v51 = vpop.eup %1761 }
 0x1fb   : > { %v484_v53 = vmul.f32 %v1762_v51, %v482_v49 }
 0x1fd   : > { %v485_v55 = vmul.f32 %v484_v53, %v2317_v29  ;;  %v491_v56 = vrot.slane %v484_v53, %v490_v50 }
 0x1ff   : > { %v486_v57 = vsub.f32 %v483_v52, %v485_v55  ;;  %v493_v58 = vmul.f32 %v491_v56, %v2325_v31  ;;  %v494_v59 = vmul.f32 %v491_v56, %v2321_v30  ;;  %v727_v60 = vmul.f32 %v491_v56, %v2286_v0 }
 0x200   : > { %v728_v61 = vmul.f32 %v491_v56, %v2294_v2  ;;  %v729_v62 = vmul.f32 %v491_v56, %v2289_v1  ;;  %v730_v10 = vmul.f32 %v491_v56, %v2297_v3  ;;  %v731_v11 = vmul.f32 %v491_v56, %v2300_v4 }
 0x201   : > { %v739_v63 = vrot.slane %v486_v57, %v490_v50  ;;  %v507_v8 = vadd.f32 %v505_v54, %v493_v58  ;;  %v508_v9 = vadd.f32 %v505_v54, %v494_v59  ;;  %v732_v29 = vmul.f32 %v491_v56, %v2303_v5 }
 0x202   : > { %v495_v12 = vmul.f32 %v491_v56, %v2337_v35  ;;  %v496_v31 = vmul.f32 %v491_v56, %v2333_v34  ;;  %v733_v35 = vmul.f32 %v491_v56, %v2308_v6  ;;  %v734_v34 = vmul.f32 %v491_v56, %v2311_v7 }
 0x203   : > { %v515_v30 = vpack.c.bf16 %v508_v9, %v507_v8  ;;  %v741_v13 = vadd.f32 %v739_v63, %v727_v60  ;;  %v742_v0 = vadd.f32 %v739_v63, %v728_v61  ;;  %v743_v15 = vadd.f32 %v739_v63, %v729_v62 }
 0x204   : > { %v744_v2 = vadd.f32 %v739_v63, %v730_v10  ;;  %v745_v16 = vadd.f32 %v739_v63, %v731_v11  ;;  %v746_v1 = vadd.f32 %v739_v63, %v732_v29  ;;  %v509_v4 = vadd.f32 %v505_v54, %v495_v12 }
 0x205   : > { %648 = vmatmul.mubr.bf16.vlgmr.msra.gmra.mrb[0].mxu0 %v515_v30  ;;  %v749_v17 = vpack.c.bf16 %v742_v0, %v741_v13  ;;  %v510_v5 = vadd.f32 %v505_v54, %v496_v31  ;;  %v747_v19 = vadd.f32 %v739_v63, %v733_v35  ;;  %v748_v20 = vadd.f32 %v739_v63, %v734_v34 }
 0x206   : > { %v750_v18 = vpack.c.bf16 %v744_v2, %v743_v15  ;;  %657 = vmatprep.mubr.bf16.mxu0 %v2017_v14  ;;  %v751_v3 = vpack.c.bf16 %v746_v1, %v745_v16  ;;  %v497_v22 = vmul.f32 %v491_v56, %v2349_v39  ;;  %v498_v23 = vmul.f32 %v491_v56, %v2345_v38 }
 0x207   : > { %1573 = vmatprep.mubr.bf16.mxu1 %v749_v17  ;;  %v516_v21 = vpack.c.bf16 %v510_v5, %v509_v4  ;;  %v752_v24 = vpack.c.bf16 %v748_v20, %v747_v19  ;;  %v499_v6 = vmul.f32 %v491_v56, %v2361_v43  ;;  %v500_v7 = vmul.f32 %v491_v56, %v2357_v42  ;;  %v1488_v42 = vld [vmem:[%s2539_s4] ss:$0 sm:$0xff] }
 0x208   : > { %1574 = vmatmul.mubr.bf16.vlgmr.msra.gmra.mrb[0].mxu1 %v750_v18  ;;  %v511_v25 = vadd.f32 %v505_v54, %v497_v22  ;;  %v512_v26 = vadd.f32 %v505_v54, %v498_v23 }
 0x209   : > { %1577 = vmatprep.mubr.bf16.mxu1 %v751_v3  ;;  %v513_v28 = vadd.f32 %v505_v54, %v499_v6  ;;  %v514_v32 = vadd.f32 %v505_v54, %v500_v7 }
 0x20a   : > { %v517_v27 = vpack.c.bf16 %v512_v26, %v511_v25 }
 0x20b   : > { %v518_v39 = vpack.c.bf16 %v514_v32, %v513_v28 }
 0x20d   : > { %658 = vmatmul.mubr.bf16.gmra.mrb[4].mxu0 %v516_v21 }
 0x20e   : > { %667 = vmatprep.mubr.bf16.mxu0 %v2017_v14 }
 0x210   : > { %1578 = vmatmul.mubr.bf16.gmra.mrb[4].mxu1 %v752_v24 }
 0x215   : > { %668 = vmatmul.mubr.bf16.gmra.mrb[8].mxu0 %v517_v27 }
 0x216   : > { %677 = vmatprep.mubr.bf16.mxu0 %v2017_v14 }
 0x21d   : > { %678 = vmatmul.mubr.bf16.gmra.mrb[12].mxu0 %v518_v39 }
 0x2d8   : > { %v649_v38 = vpop.f32.mrb[0].mxu0 }
 0x2d9   : > { %v651_v33 = vpop.f32.mrb[1].mxu0 }
 0x2da   : > { %v653_v37 = vpop.f32.mrb[2].mxu0  ;;  %v703_v14 = vadd.f32 %v2397_v36, %v651_v33 }
 0x2db   : > { %v688_v40 = vpack.c.bf16 %v653_v37, %v649_v38  ;;  %v655_v41 = vpop.f32.mrb[3].mxu0  ;;  %v1575_v43 = vpop.f32.mrb[0].mxu1 }
 0x2dc   : > { %v704_v44 = vadd.f32 %v2397_v36, %v655_v41  ;;  %v858_v45 = vpop.f32.mrb[1].mxu1  ;;  %v867_v48 = vadd.f32 %v1575_v43, %v1488_v42 }
 0x2dd   : > { %v1576_v46 = vpop.f32.mrb[2].mxu1  ;;  %1581 = vmatprep.subr.bf16.mxu0 %v688_v40  ;;  %v859_v51 = vadd.f32 %v1488_v42, %v858_v45 }
 0x2de   : > { %v711_v47 = vpack.c.bf16 %v704_v44, %v703_v14  ;;  %v870_v49 = vadd.f32 %v1576_v46, %v1488_v42  ;;  %v861_v50 = vpop.f32.mrb[3].mxu1  ;;  %1582 = vmatpush3.bf16.xpose.msra.mxu0 %v688_v40 }
 0x2df   : > { %v862_v52 = vadd.f32 %v1488_v42, %v861_v50 }
 0x2e0   : > { %v890_v53 = vpack.c.bf16 %v870_v49, %v867_v48  ;;  %v659_v54 = vpop.f32.mrb[4].mxu0  ;;  %1597 = vmatprep.subr.bf16.mxu1 %v711_v47 }
 0x2e1   : > { %v889_v55 = vpack.c.bf16 %v862_v52, %v859_v51  ;;  %v661_v56 = vpop.f32.mrb[5].mxu0  ;;  %1598 = vmatpush3.bf16.msra.mxu1 %v711_v47 }
 0x2e2   : > { %v663_v57 = vpop.f32.mrb[6].mxu0  ;;  %v705_v61 = vadd.f32 %v2397_v36, %v661_v56 }
 0x2e3   : > { %v689_v58 = vpack.c.bf16 %v663_v57, %v659_v54  ;;  %v665_v59 = vpop.f32.mrb[7].mxu0  ;;  %v1579_v60 = vpop.f32.mrb[4].mxu1  ;;  %1589 = vmatprep.mubr.bf16.mxu0 %v889_v55 }
 0x2e4   : > { %v706_v62 = vadd.f32 %v2397_v36, %v665_v59  ;;  %v874_v63 = vpop.f32.mrb[5].mxu1  ;;  %v883_v10 = vadd.f32 %v1579_v60, %v1488_v42 }
 0x2e5   : > { %v1580_v8 = vpop.f32.mrb[6].mxu1  ;;  %1583 = vmatprep.subr.bf16.mxu0 %v689_v58  ;;  %v875_v12 = vadd.f32 %v1488_v42, %v874_v63 }
 0x2e6   : > { %v712_v9 = vpack.c.bf16 %v706_v62, %v705_v61  ;;  %v886_v11 = vadd.f32 %v1580_v8, %v1488_v42  ;;  %v877_v29 = vpop.f32.mrb[7].mxu1  ;;  %1584 = vmatpush3.bf16.xpose.msra.mxu0 %v689_v58 }
 0x2e7   : > { %v878_v31 = vadd.f32 %v1488_v42, %v877_v29 }
 0x2e8   : > { %v892_v30 = vpack.c.bf16 %v886_v11, %v883_v10  ;;  %v669_v13 = vpop.f32.mrb[8].mxu0  ;;  %1599 = vmatprep.subr.bf16.mxu1 %v712_v9 }
 0x2e9   : > { %v891_v0 = vpack.c.bf16 %v878_v31, %v875_v12  ;;  %v671_v15 = vpop.f32.mrb[9].mxu0  ;;  %1600 = vmatpush3.bf16.msra.mxu1 %v712_v9 }
 0x2ea   : > { %v673_v2 = vpop.f32.mrb[10].mxu0  ;;  %v707_v17 = vadd.f32 %v2397_v36, %v671_v15 }
 0x2eb   : > { %v690_v16 = vpack.c.bf16 %v673_v2, %v669_v13  ;;  %v675_v1 = vpop.f32.mrb[11].mxu0 }
 0x2ec   : > { %v708_v18 = vadd.f32 %v2397_v36, %v675_v1 }
 0x2ed   : > { %1585 = vmatprep.subr.bf16.mxu0 %v690_v16 }
 0x2ee   : > { %v713_v3 = vpack.c.bf16 %v708_v18, %v707_v17  ;;  %1586 = vmatpush3.bf16.xpose.msra.mxu0 %v690_v16 }
 0x2f0   : > { %v679_v4 = vpop.f32.mrb[12].mxu0  ;;  %1601 = vmatprep.subr.bf16.mxu1 %v713_v3 }
 0x2f1   : > { %v681_v5 = vpop.f32.mrb[13].mxu0  ;;  %1602 = vmatpush3.bf16.msra.mxu1 %v713_v3 }
 0x2f2   : > { %v683_v35 = vpop.f32.mrb[14].mxu0  ;;  %v709_v20 = vadd.f32 %v2397_v36, %v681_v5 }
 0x2f3   : > { %v691_v34 = vpack.c.bf16 %v683_v35, %v679_v4  ;;  %v685_v19 = vpop.f32.mrb[15].mxu0 }
 0x2f4   : > { %v710_v21 = vadd.f32 %v2397_v36, %v685_v19  ;;  %v1753_v19 = vld [vmem:[#allocation10] sm:$0xff]  }
 0x2f5   : > { %1587 = vmatprep.subr.bf16.mxu0 %v691_v34 }
 0x2f6   : > { %v714_v22 = vpack.c.bf16 %v710_v21, %v709_v20  ;;  %1588 = vmatpush3.bf16.xpose.msra.mxu0 %v691_v34  ;;  %v1754_v20 = vld [vmem:[#allocation10 + $0x8] sm:$0xff]   ;;  %v1755_v21 = vld [vmem:[#allocation10 + $0x10] sm:$0xff]  }
 0x2f8   : > { %1603 = vmatprep.subr.bf16.mxu1 %v714_v22 }
 0x2f9   : > { %1604 = vmatpush3.bf16.msra.mxu1 %v714_v22  ;;  %v1756_v22 = vld [vmem:[#allocation10 + $0x18] sm:$0xff]  }
 0x2fa   : > { %1613 = vmatprep.subr.bf16.mxu1 %v1753_v19 }
 0x2fd   : > { %1590 = vmatmul.mubr.bf16.vlgmr.msra.gmra.mrb[16].mxu0 %v890_v53 }
 0x2fe   : > { %1593 = vmatprep.mubr.bf16.mxu0 %v891_v0 }
 0x305   : > { %1594 = vmatmul.mubr.bf16.gmra.mrb[20].mxu0 %v892_v30 }
 0x3d0   : > { %v1591_v23 = vpop.f32.mrb[16].mxu0 }
 0x3d1   : > { %v935_v24 = vpop.f32.mrb[17].mxu0  ;;  %v973_v7 = vsel %vm966_vm0, %v1591_v23, -inf }
 0x3d2   : > { %v1592_v25 = vpop.f32.mrb[18].mxu0  ;;  %v967_v26 = vsel %vm966_vm0, %v935_v24, -inf }
 0x3d3   : > { %968 = vmax.xlane.f32.xlu0 %v967_v26  ;;  %v938_v27 = vpop.f32.mrb[19].mxu0  ;;  %v976_v32 = vsel %vm966_vm0, %v1592_v25, -inf  ;;  %v1760_v26 = vld [vmem:[#allocation10 + $0x38] sm:$0xff]  }
 0x3d4   : > { %v970_v6 = vsel %vm966_vm0, %v938_v27, -inf }
 0x3d5   : > { %971 = vmax.xlane.f32.xlu1 %v970_v6 }
 0x3d7   : > { %974 = vmax.xlane.f32.xlu0 %v973_v7 }
 0x3d8   : > { %v1595_v28 = vpop.f32.mrb[20].mxu0 }
 0x3d9   : > { %977 = vmax.xlane.f32.xlu1 %v976_v32  ;;  %v951_v39 = vpop.f32.mrb[21].mxu0  ;;  %v985_v40 = vsel %vm966_vm0, %v1595_v28, -inf }
 0x3da   : > { %v1596_v38 = vpop.f32.mrb[22].mxu0  ;;  %v979_v33 = vsel %vm966_vm0, %v951_v39, -inf }
 0x3db   : > { %980 = vmax.xlane.f32.xlu0 %v979_v33  ;;  %v954_v36 = vpop.f32.mrb[23].mxu0  ;;  %v988_v41 = vsel %vm966_vm0, %v1596_v38, -inf }
 0x3dc   : > { %v982_v37 = vsel %vm966_vm0, %v954_v36, -inf }
 0x3dd   : > { %983 = vmax.xlane.f32.xlu1 %v982_v37 }
 0x3df   : > { %986 = vmax.xlane.f32.xlu0 %v985_v40 }
 0x3e1   : > { %989 = vmax.xlane.f32.xlu1 %v988_v41 }
 0x460   : > { %v2418_v43 = vpop.xlane.xlu0 %968 }
 0x461   : > { %v1015_v42 = vsub.f32 %v935_v24, %v2418_v43  ;;  %v1758_v24 = vld [vmem:[#allocation10 + $0x28] sm:$0xff]   ;;  %v991_v6 = vsub.f32 -inf, %v2418_v43 }
 0x462   : > { %v2421_v14 = vpop.xlane.xlu1 %971 }
 0x463   : > { %v1023_v44 = vmul.f32 1.442695, %v1015_v42  ;;  %v1016_v45 = vsub.f32 %v938_v27, %v2421_v14 }
 0x464   : > { %v2424_v46 = vpop.xlane.xlu0 %974 }
 0x465   : > { %v1025_v47 = vmul.f32 1.442695, %v1016_v45  ;;  %1763 = vpow2.f32 %v1023_v44  ;;  %v1017_v48 = vsub.f32 %v1591_v23, %v2424_v46  ;;  %v1757_v23 = vld [vmem:[#allocation10 + $0x20] sm:$0xff]   ;;  %v993_v27 = vsub.f32 -inf, %v2424_v46 }
 0x466   : > { %v2427_v49 = vpop.xlane.xlu1 %977 }
 0x467   : > { %v1018_v50 = vsub.f32 %v1592_v25, %v2427_v49  ;;  %1765 = vpow2.f32 %v1025_v47  ;;  %v1027_v51 = vmul.f32 1.442695, %v1017_v48  ;;  %v1759_v25 = vld [vmem:[#allocation10 + $0x30] sm:$0xff]   ;;  %v994_v7 = vsub.f32 -inf, %v2427_v49 }
 0x468   : > { %v2430_v52 = vpop.xlane.xlu0 %980  ;;  %v1003_v32 = vmul.f32 1.442695, %v993_v27 }
 0x469   : > { %v1029_v53 = vmul.f32 1.442695, %v1018_v50  ;;  %1767 = vpow2.f32 %v1027_v51  ;;  %v1019_v54 = vsub.f32 %v951_v39, %v2430_v52  ;;  %v999_v39 = vmul.f32 1.442695, %v991_v6 }
 0x46a   : > { %v2433_v55 = vpop.xlane.xlu1 %983 }
 0x46b   : > { %v1020_v56 = vsub.f32 %v954_v36, %v2433_v55  ;;  %1769 = vpow2.f32 %v1029_v53  ;;  %v1031_v57 = vmul.f32 1.442695, %v1019_v54  ;;  %v995_v36 = vsub.f32 -inf, %v2430_v52 }
 0x46c   : > { %v2436_v58 = vpop.xlane.xlu0 %986  ;;  %v996_v41 = vsub.f32 -inf, %v2433_v55 }
 0x46d   : > { %v1033_v59 = vmul.f32 1.442695, %v1020_v56  ;;  %1771 = vpow2.f32 %v1031_v57  ;;  %v1021_v60 = vsub.f32 %v1595_v28, %v2436_v58  ;;  %v992_v28 = vsub.f32 -inf, %v2421_v14 }
 0x46e   : > { %v2439_v61 = vpop.xlane.xlu1 %989  ;;  %v997_v37 = vsub.f32 -inf, %v2436_v58  ;;  %v1007_v42 = vmul.f32 1.442695, %v995_v36  ;;  %v1009_v46 = vmul.f32 1.442695, %v996_v41 }
 0x46f   : > { %v1022_v62 = vsub.f32 %v1596_v38, %v2439_v61  ;;  %v1764_v63 = vpop.eup %1763  ;;  %1773 = vpow2.f32 %v1033_v59  ;;  %v1035_v8 = vmul.f32 1.442695, %v1021_v60  ;;  %v1005_v38 = vmul.f32 1.442695, %v994_v7 }
 0x470   : > { %v1047_v10 = vsel %vm966_vm0, %v1764_v63, 0.0  ;;  %v1001_v33 = vmul.f32 1.442695, %v992_v28  ;;  %v998_v40 = vsub.f32 -inf, %v2439_v61  ;;  %v1011_v14 = vmul.f32 1.442695, %v997_v37 }
 0x471   : > { %v1037_v9 = vmul.f32 1.442695, %v1022_v62  ;;  %v1766_v11 = vpop.eup %1765  ;;  %1775 = vpow2.f32 %v1035_v8  ;;  %1048 = vadd.xlane.f32.xlu0 %v1047_v10 }
 0x472   : > { %v1050_v29 = vsel %vm966_vm0, %v1766_v11, 0.0  ;;  %v1079_v12 = vpack.c.bf16 %v1766_v11, %v1764_v63  ;;  %v1013_v45 = vmul.f32 1.442695, %v998_v40 }
 0x473   : > { %v1768_v31 = vpop.eup %1767  ;;  %1777 = vpow2.f32 %v1037_v9  ;;  %1051 = vadd.xlane.f32.xlu1 %v1050_v29 }
 0x474   : > { %1605 = vmatprep.mubr.msk.bf16.mxu1 %vm966_vm0, %v1079_v12  ;;  %v1053_v30 = vsel %vm966_vm0, %v1768_v31, 0.0  ;;  %1779 = vpow2.f32 %v1003_v32 }
 0x475   : > { %v1770_v13 = vpop.eup %1769  ;;  %1054 = vadd.xlane.f32.xlu0 %v1053_v30  ;;  %1781 = vpow2.f32 %v999_v39 }
 0x476   : > { %v1080_v0 = vpack.c.bf16 %v1770_v13, %v1768_v31  ;;  %v1056_v15 = vsel %vm966_vm0, %v1770_v13, 0.0  ;;  %1783 = vpow2.f32 %v1005_v38 }
 0x477   : > { %v1772_v2 = vpop.eup %1771  ;;  %1057 = vadd.xlane.f32.xlu1 %v1056_v15  ;;  %1785 = vpow2.f32 %v1001_v33 }
 0x478   : > { %1606 = vmatmul.mubr.msk.bf16.vlgmr.msra.gmra.mrb[8].mxu1 %vm966_vm0, %v1080_v0  ;;  %v1059_v16 = vsel %vm966_vm0, %v1772_v2, 0.0  ;;  %1787 = vpow2.f32 %v1007_v42 }
 0x479   : > { %v1774_v1 = vpop.eup %1773  ;;  %1060 = vadd.xlane.f32.xlu0 %v1059_v16  ;;  %1614 = vmatpush3.bf16.msra.mxu1 %v1753_v19  ;;  %1789 = vpow2.f32 %v1011_v14 }
 0x47a   : > { %v1062_v17 = vsel %vm966_vm0, %v1774_v1, 0.0  ;;  %v1081_v18 = vpack.c.bf16 %v1774_v1, %v1772_v2  ;;  %1615 = vmatprep.subr.bf16.mxu1 %v1754_v20  ;;  %1791 = vpow2.f32 %v1013_v45 }
 0x47b   : > { %v1776_v3 = vpop.eup %1775  ;;  %1063 = vadd.xlane.f32.xlu1 %v1062_v17  ;;  %1793 = vpow2.f32 %v1009_v46 }
 0x47c   : > { %1609 = vmatprep.mubr.msk.bf16.mxu1 %vm966_vm0, %v1081_v18  ;;  %v1065_v4 = vsel %vm966_vm0, %v1776_v3, 0.0 }
 0x47d   : > { %v1778_v5 = vpop.eup %1777  ;;  %1066 = vadd.xlane.f32.xlu0 %v1065_v4  ;;  %1616 = vmatpush3.bf16.msra.mxu1 %v1754_v20 }
 0x47e   : > { %v1068_v35 = vsel %vm966_vm0, %v1778_v5, 0.0  ;;  %v1082_v34 = vpack.c.bf16 %v1778_v5, %v1776_v3  ;;  %1617 = vmatprep.subr.bf16.mxu1 %v1755_v21  ;;  %v1780_v48 = vpop.eup %1779 }
 0x47f   : > { %1069 = vadd.xlane.f32.xlu1 %v1068_v35  ;;  %v1782_v50 = vpop.eup %1781  ;;  %v1041_v53 = vmul.f32 0.0, %v1780_v48 }
 0x480   : > { %1610 = vmatmul.mubr.msk.bf16.gmra.mrb[12].mxu1 %vm966_vm0, %v1082_v34  ;;  %v1784_v51 = vpop.eup %1783  ;;  %v1039_v54 = vmul.f32 0.0, %v1782_v50 }
 0x481   : > { %1618 = vmatpush3.bf16.msra.mxu1 %v1755_v21  ;;  %v1786_v52 = vpop.eup %1785  ;;  %v1042_v55 = vmul.f32 0.0, %v1784_v51 }
 0x482   : > { %1619 = vmatprep.subr.bf16.mxu1 %v1756_v22  ;;  %v1040_v59 = vmul.f32 0.0, %v1786_v52  ;;  %v1788_v62 = vpop.eup %1787 }
 0x483   : > { %v1790_v8 = vpop.eup %1789  ;;  %v1043_v11 = vmul.f32 0.0, %v1788_v62  ;;  %v1813_v62 = vld [vmem:[%s2271_s3 + $0x18] sm:$0xff] }
 0x484   : > { %v1792_v9 = vpop.eup %1791  ;;  %v1045_v12 = vmul.f32 0.0, %v1790_v8  ;;  %v1814_v8 = vld [vmem:[%s2271_s3 + $0x8] sm:$0xff] }
 0x485   : > { %1620 = vmatpush3.bf16.msra.mxu1 %v1756_v22  ;;  %v1794_v10 = vpop.eup %1793  ;;  %v1046_v13 = vmul.f32 0.0, %v1792_v9 }
 0x486   : > { %1621 = vmatprep.subr.bf16.mxu1 %v1757_v23  ;;  %v1044_v0 = vmul.f32 0.0, %v1794_v10 }
 0x489   : > { %1622 = vmatpush3.bf16.msra.mxu1 %v1757_v23 }
 0x48a   : > { %1623 = vmatprep.subr.bf16.mxu1 %v1758_v24 }
 0x48d   : > { %1624 = vmatpush3.bf16.msra.mxu1 %v1758_v24 }
 0x48e   : > { %1625 = vmatprep.subr.bf16.mxu1 %v1759_v25 }
 0x491   : > { %1626 = vmatpush3.bf16.msra.mxu1 %v1759_v25 }
 0x492   : > { %1627 = vmatprep.subr.bf16.mxu1 %v1760_v26 }
 0x495   : > { %1628 = vmatpush3.bf16.msra.mxu1 %v1760_v26 }
 0x4fe   : > { %v1049_v43 = vpop.xlane.xlu0 %1048 }
 0x4ff   : > { %v1071_v58 = vadd.f32 %v1049_v43, %v1039_v54 }
 0x500   : > { %v1052_v44 = vpop.xlane.xlu1 %1051 }
 0x501   : > { %v1072_v63 = vadd.f32 %v1052_v44, %v1040_v59 }
 0x502   : > { %v1055_v47 = vpop.xlane.xlu0 %1054 }
 0x503   : > { %v1073_v56 = vadd.f32 %v1055_v47, %v1041_v53 }
 0x504   : > { %v1058_v49 = vpop.xlane.xlu1 %1057 }
 0x505   : > { %v1074_v61 = vadd.f32 %v1058_v49, %v1042_v55  ;;  %1795 = vrcp.f32 %v1073_v56  ;;  %v1501_v49 = vld [vmem:[%s2543_s8] ss:$0 sm:$0xff]  ;;  %v1811_v56 = vld [vmem:[%s2271_s3 + $0x10] sm:$0xff] }
 0x506   : > { %v1061_v57 = vpop.xlane.xlu0 %1060  ;;  %1797 = vrcp.f32 %v1071_v58 }
 0x507   : > { %1799 = vrcp.f32 %v1074_v61  ;;  %v1075_v30 = vadd.f32 %v1061_v57, %v1043_v11 }
 0x508   : > { %v1064_v60 = vpop.xlane.xlu1 %1063  ;;  %1801 = vrcp.f32 %v1072_v63 }
 0x509   : > { %v1076_v16 = vadd.f32 %v1064_v60, %v1044_v0  ;;  %1803 = vrcp.f32 %v1075_v30  ;;  %v1815_v30 = vld [vmem:[%s2271_s3 + $0x30] sm:$0xff] }
 0x50a   : > { %v1067_v29 = vpop.xlane.xlu0 %1066 }
 0x50b   : > { %v1077_v15 = vadd.f32 %v1067_v29, %v1045_v12 }
 0x50c   : > { %v1070_v31 = vpop.xlane.xlu1 %1069 }
 0x50d   : > { %v1078_v2 = vadd.f32 %v1070_v31, %v1046_v13  ;;  %1805 = vrcp.f32 %v1077_v15 }
 0x50f   : > { %v1796_v3 = vpop.eup %1795  ;;  %1807 = vrcp.f32 %v1078_v2  ;;  %v1816_v2 = vld [vmem:[%s2271_s3 + $0x20] sm:$0xff] }
 0x510   : > { %v1798_v35 = vpop.eup %1797  ;;  %1809 = vrcp.f32 %v1076_v16 }
 0x511   : > { %v1800_v21 = vpop.eup %1799 }
 0x512   : > { %v1802_v24 = vpop.eup %1801 }
 0x513   : > { %v1804_v39 = vpop.eup %1803 }
 0x517   : > { %v1806_v36 = vpop.eup %1805 }
 0x519   : > { %v1808_v41 = vpop.eup %1807 }
 0x51a   : > { %v1810_v44 = vpop.eup %1809 }
 0x54b   : > { %v1607_v1 = vpop.f32.mrb[8].mxu1 }
 0x54c   : > { %v1162_v17 = vadd.f32 %v1607_v1, %v1041_v53  ;;  %v1129_v18 = vpop.f32.mrb[9].mxu1 }
 0x54d   : > { %v1160_v4 = vadd.f32 %v1129_v18, %v1039_v54  ;;  %v1608_v5 = vpop.f32.mrb[10].mxu1 }
 0x54e   : > { %v1178_v34 = vmul.f32 %v1796_v3, %v1162_v17  ;;  %v1163_v19 = vadd.f32 %v1608_v5, %v1042_v55  ;;  %v1132_v20 = vpop.f32.mrb[11].mxu1  ;;  %v1817_v17 = vld [vmem:[%s2271_s3 + $0x38] sm:$0xff]  ;;  %v1818_v3 = vld [vmem:[%s2271_s3 + $0x28] sm:$0xff] }
 0x54f   : > { %v1176_v22 = vmul.f32 %v1798_v35, %v1160_v4  ;;  %v1161_v23 = vadd.f32 %v1132_v20, %v1040_v59  ;;  %v1812_v59 = vld [vmem:[%s2271_s3] sm:$0xff] }
 0x550   : > { %v1179_v25 = vmul.f32 %v1800_v21, %v1163_v19 }
 0x551   : > { %v1177_v26 = vmul.f32 %v1802_v24, %v1161_v23 }
 0x552   : > { %v1185_v27 = vpack.c.bf16 %v1179_v25, %v1178_v34 }
 0x553   : > { %v1611_v6 = vpop.f32.mrb[12].mxu1  ;;  %v1184_v7 = vpack.c.bf16 %v1177_v26, %v1176_v22 }
 0x554   : > { %v1166_v28 = vadd.f32 %v1611_v6, %v1045_v12  ;;  %v1145_v32 = vpop.f32.mrb[13].mxu1 }
 0x555   : > { %v1164_v38 = vadd.f32 %v1145_v32, %v1043_v11  ;;  %v1612_v33 = vpop.f32.mrb[14].mxu1  ;;  %1629 = vmatprep.mubr.bf16.mxu1 %v1184_v7 }
 0x556   : > { %v1167_v37 = vadd.f32 %v1612_v33, %v1046_v13  ;;  %v1148_v40 = vpop.f32.mrb[15].mxu1  ;;  %1630 = vmatmul.mubr.bf16.vlgmr.msra.gmra.mrb[16].mxu1 %v1185_v27  ;;  %v1182_v14 = vmul.f32 %v1806_v36, %v1166_v28 }
 0x557   : > { %v1180_v43 = vmul.f32 %v1804_v39, %v1164_v38  ;;  %v1165_v42 = vadd.f32 %v1148_v40, %v1044_v0 }
 0x558   : > { %v1183_v45 = vmul.f32 %v1808_v41, %v1167_v37 }
 0x559   : > { %v1181_v46 = vmul.f32 %v1810_v44, %v1165_v42 }
 0x55a   : > { %v1187_v47 = vpack.c.bf16 %v1183_v45, %v1182_v14 }
 0x55b   : > { %v1186_v48 = vpack.c.bf16 %v1181_v46, %v1180_v43 }
 0x55d   : > { %1633 = vmatprep.mubr.bf16.mxu1 %v1186_v48 }
 0x55e   : > { %1634 = vmatmul.mubr.bf16.gmra.mrb[20].mxu1 %v1187_v47 }
 0x629   : > { %v1631_v50 = vpop.f32.mrb[16].mxu1 }
 0x62a   : > { %v1302_v51 = vadd.f32 %v1631_v50, %v1501_v49  ;;  %v1293_v52 = vpop.f32.mrb[17].mxu1 }
 0x62b   : > { %v1294_v53 = vadd.f32 %v1501_v49, %v1293_v52  ;;  %v1632_v54 = vpop.f32.mrb[18].mxu1 }
 0x62c   : > { %v1326_v55 = vadd.f32 %v1811_v56, %v1302_v51  ;;  %v1305_v57 = vadd.f32 %v1632_v54, %v1501_v49  ;;  %v1296_v58 = vpop.f32.mrb[19].mxu1 }
 0x62d   : > { %v1324_v60 = vadd.f32 %v1812_v59, %v1294_v53  ;;  %v1297_v61 = vadd.f32 %v1501_v49, %v1296_v58 }
 0x62e   : > { %1334 = vst [vmem:[%s2469_s20 + $0x10] sm:$0xff] %v1326_v55  ;;  %v1327_v63 = vadd.f32 %v1813_v62, %v1305_v57 }
 0x62f   : > { %1332 = vst [vmem:[%s2469_s20] sm:$0xff] %v1324_v60  ;;  %v1325_v9 = vadd.f32 %v1814_v8, %v1297_v61 }
 0x630   : > { %1335 = vst [vmem:[%s2469_s20 + $0x18] sm:$0xff] %v1327_v63 }
 0x631   : > { %1333 = vst [vmem:[%s2469_s20 + $0x8] sm:$0xff] %v1325_v9  ;;  %v1635_v10 = vpop.f32.mrb[20].mxu1 }
 0x632   : > { %v1318_v11 = vadd.f32 %v1635_v10, %v1501_v49  ;;  %v1309_v29 = vpop.f32.mrb[21].mxu1 }
 0x633   : > { %v1310_v12 = vadd.f32 %v1501_v49, %v1309_v29  ;;  %v1636_v31 = vpop.f32.mrb[22].mxu1 }
 0x634   : > { %v1330_v13 = vadd.f32 %v1815_v30, %v1318_v11  ;;  %v1321_v0 = vadd.f32 %v1636_v31, %v1501_v49  ;;  %v1312_v15 = vpop.f32.mrb[23].mxu1 }
 0x635   : > { %v1328_v16 = vadd.f32 %v1816_v2, %v1310_v12  ;;  %v1313_v1 = vadd.f32 %v1501_v49, %v1312_v15 }
 0x636   : > { %1338 = vst [vmem:[%s2469_s20 + $0x30] sm:$0xff] %v1330_v13  ;;  %v1331_v18 = vadd.f32 %v1817_v17, %v1321_v0 }
 0x637   : > { %1336 = vst [vmem:[%s2469_s20 + $0x20] sm:$0xff] %v1328_v16  ;;  %v1329_v4 = vadd.f32 %v1818_v3, %v1313_v1 }
 0x638   : > { %1339 = vst [vmem:[%s2469_s20 + $0x38] sm:$0xff] %v1331_v18 }
 0x639   : > { %1337 = vst [vmem:[%s2469_s20 + $0x28] sm:$0xff] %v1329_v4 }
 0x63a   : > { %1946 = shalt.err (!%p1943_p12)
}
 0x63b   : > { %s1947_s3 = scalar_lea.hbm %s2488_s17, 1024  ;;  %s1951_s21 = scalar_lea.hbm %s2574_s15, 4096 }
 0x63c   : > { %p1948_p0 = scmp.ne.s32.totalorder %s2488_s17, %s1947_s3  ;;  %p1952_p1 = scmp.lt.u32.totalorder %s2488_s17, %s2574_s15 }
 0x63d   : > { %p1953_p2 = scmp.lt.u32.totalorder %s1951_s21, %s1947_s3  ;;  %p1955_p6 = scmp.lt.u32.totalorder %s1947_s3, %s2488_s17 }
 0x63e   : > { %p1949_p5 = pnand %p1948_p0, %p2214_p11 }
 0x63f   : > { %p1954_p4 = por %p1953_p2, %p1952_p1 }
 0x640   : > { %p1950_p10 = pneg %p1949_p5 }
 0x641   : > { %p1956_p8 = por %p1955_p6, %p1954_p4 }
 0x643   : > { %p1957_p13 = pnand %p1956_p8, %p1950_p10 }
 0x645   : > { %1960 = shalt.err (!%p1957_p13)
}
 0x646   : > { %s2019_s19 = smov 128   ;;  %s2020_s13 = smov 8  }
 0x647   : > { %1651 = dma.vmem_to_hbm [thread:$0]  (%p2214_p11), %s2480_s14, 1024, %s2488_s17, %s1341_s24, %s2019_s19, %s2019_s19, %s2020_s13  }
 0x648 PF: > { %s2575_s30 = sld [smem:[#allocation17_spill]]  ;;  %s2576_s27 = sld [smem:[#allocation18_spill]] }
 0x649   : > { %p1678_p3 = scmp.ge.s32.totalorder %s2007_s12, 2 }
 0x64e   : > { %s1369_s23 = sand.u32 1, %s2575_s30   ;;  %p2577_p7 = scmp.ne.s32.totalorder %s2576_s27, 0 }
 0x64f   : > { %s1370_s9 = scalar_lea.sflag [#allocation6], %s1369_s23 }
 0x650   : > { %p1668_p9 = pnand %p1678_p3, %p2577_p7 }
 0x652   : > { %1990 = dma.done.wait (!%p1668_p9), %s1370_s9, 1024  }
 0x653   : > { %1992 = vsyncadd (!%p1668_p9), %s1370_s9, 4294966272  ;;  %p24_p12 = scmp.ge.s32.totalorder %s2179_s29, 6   ;;  %s2578_s30 = smov %s1999_s10 }
 0x654   : > { %s2579_s10 = smov %s2003_s11  ;;  %s2580_s11 = smov %s2210_s16 }
 0x655   : > { %s2581_s12 = smov %s2179_s29  ;;  %26 = sbr.rel (!%p24_p12) target bundleno = 10 (0xa), region = 113 }
 0x65c   :  { %1375 = vsyncpa [#allocation5], 1 }
 0x65d   :  { %1377 = vsyncpa [#allocation5 + $0x1], 1 }
 0x65e   :  { %1378 = vsyncpa [#allocation8], 1 }
 0x65f   :  { %1379 = vsyncpa [#allocation11], 1 }
 0x660   :  { %1380 = vsyncpa [#allocation6], 1 }
 0x661   :  { %1382 = vsyncpa [#allocation6 + $0x1], 1 }

</bundles_post_ra>
